<compile_context>
chip_gen: v5e
topology: v5e:2x2
jax: 0.10.0
libtpu: 0.0.40
codegen_flags: <defaults>
</compile_context>

<pallas_src>
from functools import partial

import jax
import jax.numpy as jnp
from jax import lax
from jax.experimental import pallas as pl
from jax.experimental.pallas import tpu as pltpu

BN_EPS = 1e-5


def _round_up(x, m):
    return ((x + m - 1) // m) * m


def _detect_vmem_bytes():
    try:
        cap = getattr(pltpu.get_tpu_info(), "vmem_capacity_bytes", None)
        if cap:
            return int(cap)
    except Exception:
        pass
    return 64 * 1024 * 1024  # conservative (v7x-sized) fallback


_VMEM_PHYS = _detect_vmem_bytes()
_TILE_BUDGET = int(_VMEM_PHYS * 0.60)                     # for tile sizing
_VMEM_LIMIT = min(int(_VMEM_PHYS * 0.75), 100 * 1024 * 1024)  # vmem_limit_bytes


def _choose_row_tile(H, W, Cin, Cp, budget):
    """Largest divisor TH of H whose pass-1 working set fits the VMEM budget."""
    def cost(d):
        return (2 * d * (W + 2) * Cin * 2        # main x tile, double-buffered, bf16
                + 4 * (W + 2) * Cin * 2          # two 1-row halo tiles
                + 2 * 9 * Cin * Cp * 2           # weights (constant-index, 2 bufs)
                + 2 * d * W * Cp * 2             # y out tile, double-buffered, bf16
                + d * W * Cp * 4)                # f32 accumulator temporary
    divisors = sorted((d for d in range(1, H + 1) if H % d == 0), reverse=True)
    for d in divisors:                            # prefer 8-aligned row counts
        if cost(d) <= budget and (d * W) % 8 == 0:
            return d
    for d in divisors:
        if cost(d) <= budget:
            return d
    return 1


# ---------------------------------------------------------------------------
# Pass 1: 3x3 conv via 9 shifted bf16 matmuls + per-channel sum / sumsq.
# ---------------------------------------------------------------------------
def _conv_stats_kernel(x_ref, h1_ref, h2_ref, w_ref, y_ref, sum_ref, sumsq_ref,
                       *, TH, W, Cp, sublane_ok):
    # x_ref:     (1, TH, W+2, Cin)  padded-input rows [h*TH, h*TH+TH)      (bf16)
    # h1_ref:    (1, 1,  W+2, Cin)  halo row h*TH+TH                        (bf16)
    # h2_ref:    (1, 1,  W+2, Cin)  halo row h*TH+TH+1                      (bf16)
    # w_ref:     (9, Cin, Cp)       conv weights, channels padded to Cp     (bf16)
    # y_ref:     (1, TH, W, Cp)     conv output tile                        (bf16)
    # sum_ref:   (8, Cp)            resident per-core partial channel sums  (f32)
    # sumsq_ref: (8, Cp)            resident per-core partial sum-of-squares(f32)
    first = jnp.logical_and(pl.program_id(1) == 0, pl.program_id(2) == 0)

    @pl.when(first)
    def _():
        sum_ref[...] = jnp.zeros_like(sum_ref)
        sumsq_ref[...] = jnp.zeros_like(sumsq_ref)

    cin = x_ref.shape[-1]
    # (TH+2, W+2, Cin) haloed slab assembled in VMEM (no HBM im2col).
    xcat = jnp.concatenate([x_ref[0], h1_ref[0], h2_ref[0]], axis=0)

    # 3x3 conv as 9 shifted matmuls, accumulated in f32 on the MXU.
    # (Conv bias dropped: exactly cancelled by train-mode BN mean subtraction.)
    acc = None
    k = 0
    for ky in range(3):
        for kx in range(3):
            xs = xcat[ky:ky + TH, kx:kx + W, :].reshape(TH * W, cin)
            part = jnp.dot(xs, w_ref[k], preferred_element_type=jnp.float32)
            acc = part if acc is None else acc + part
            k += 1

    y_ref[0] = acc.reshape(TH, W, Cp).astype(y_ref.dtype)

    # Per-channel stats.  When TH*W is a multiple of 8 keep the reduction at
    # sublane granularity (cheap VPU adds); final collapse of the 8 rows (and
    # the per-core slabs) happens once, outside, on a tiny array.
    if sublane_ok:
        a3 = acc.reshape(TH * W // 8, 8, Cp)
        sum_ref[...] += jnp.sum(a3, axis=0)
        sumsq_ref[...] += jnp.sum(a3 * a3, axis=0)
    else:
        sum_ref[0:1, :] += jnp.sum(acc, axis=0, keepdims=True)
        sumsq_ref[0:1, :] += jnp.sum(acc * acc, axis=0, keepdims=True)


# ---------------------------------------------------------------------------
# Pass 2: fused  out = max(y * scale + shift, 0)
# ---------------------------------------------------------------------------
def _bn_relu_kernel(y_ref, p_ref, o_ref):
    # y_ref: (1, TH, W, Cp) bf16;  p_ref: (8, Cp) f32 (row0=scale, row1=shift)
    scale = p_ref[0:1, :]
    shift = p_ref[1:2, :]
    y = y_ref[...].astype(jnp.float32)
    o_ref[...] = jnp.maximum(y * scale + shift, 0.0).astype(o_ref.dtype)


def conv_block_forward(x_nchw, conv_w, conv_b, bn_gamma, bn_beta):
    """ConvBlock.forward. x_nchw: (N, Cin, H, W); conv_w: (Cout, Cin, 3, 3)."""
    del conv_b  # mathematically cancelled by train-mode BN mean subtraction
    N, Cin, H, W = x_nchw.shape
    Cout = conv_w.shape[0]
    Cp = _round_up(Cout, 128)            # lane-dense channel dim
    out_dtype = x_nchw.dtype

    # ---- glue: NCHW -> spatially padded NHWC bf16 (only HBM copy of input) ----
    x_nhwc = jnp.transpose(x_nchw, (0, 2, 3, 1)).astype(jnp.bfloat16)
    xp = jnp.pad(x_nhwc, ((0, 0), (1, 1), (1, 1), (0, 0)))

    # weights: (Cout, Cin, 3, 3) -> (ky, kx, Cin, Cout) -> (9, Cin, Cp), bf16
    w = jnp.transpose(conv_w, (2, 3, 1, 0)).reshape(9, Cin, Cout)
    w = jnp.pad(w, ((0, 0), (0, 0), (0, Cp - Cout))).astype(jnp.bfloat16)

    ncores = 2 if N % 2 == 0 else 1       # v7x megacore split along batch
    npc = N // ncores
    TH = _choose_row_tile(H, W, Cin, Cp, _TILE_BUDGET)
    HB = H // TH
    sublane_ok = (TH * W) % 8 == 0

    # ---- pass 1: conv + stats accumulation (no HBM im2col) ----
    kern1 = partial(_conv_stats_kernel, TH=TH, W=W, Cp=Cp, sublane_ok=sublane_ok)
    y, sum8, sumsq8 = pl.pallas_call(
        kern1,
        out_shape=(jax.ShapeDtypeStruct((N, H, W, Cp), jnp.bfloat16),
                   jax.ShapeDtypeStruct((ncores * 8, Cp), jnp.float32),
                   jax.ShapeDtypeStruct((ncores * 8, Cp), jnp.float32)),
        grid=(ncores, npc, HB),
        in_specs=[
            # main TH rows of the padded image
            pl.BlockSpec((1, TH, W + 2, Cin),
                         lambda c, n, h: (c * npc + n, h, 0, 0)),
            # 2-row halo below the tile (single-row blocks -> element indices)
            pl.BlockSpec((1, 1, W + 2, Cin),
                         lambda c, n, h: (c * npc + n, (h + 1) * TH, 0, 0)),
            pl.BlockSpec((1, 1, W + 2, Cin),
                         lambda c, n, h: (c * npc + n, (h + 1) * TH + 1, 0, 0)),
            # weights (constant index; second buffer is only 9*Cin*Cp*2 bytes)
            pl.BlockSpec((9, Cin, Cp), lambda c, n, h: (0, 0, 0)),
        ],
        out_specs=(
            pl.BlockSpec((1, TH, W, Cp), lambda c, n, h: (c * npc + n, h, 0, 0)),
            pl.BlockSpec((8, Cp), lambda c, n, h: (c, 0)),   # resident per core
            pl.BlockSpec((8, Cp), lambda c, n, h: (c, 0)),   # resident per core
        ),
        compiler_params=pltpu.CompilerParams(
            dimension_semantics=("parallel", "arbitrary", "arbitrary"),
            vmem_limit_bytes=_VMEM_LIMIT),
    )(xp, xp, xp, w)

    # ---- tiny per-channel math between passes (O(Cout), f32) ----
    # Note: var = E[y^2] - E[y]^2 can cancel when |mean| >> std; clamped at 0.
    n_elems = jnp.float32(N * H * W)
    s = jnp.sum(sum8, axis=0)
    ss = jnp.sum(sumsq8, axis=0)
    mean = s / n_elems
    var = jnp.maximum(ss / n_elems - mean * mean, 0.0)       # biased (PyTorch BN)
    gamma_p = jnp.pad(bn_gamma.astype(jnp.float32), (0, Cp - Cout))
    beta_p = jnp.pad(bn_beta.astype(jnp.float32), (0, Cp - Cout))
    scale = gamma_p * lax.rsqrt(var + BN_EPS)
    shift = beta_p - mean * scale
    params = jnp.zeros((8, Cp), jnp.float32).at[0].set(scale).at[1].set(shift)

    # ---- pass 2: normalize + ReLU (fully parallel, lane-dense stores) ----
    out_nhwc = pl.pallas_call(
        _bn_relu_kernel,
        out_shape=jax.ShapeDtypeStruct((N, H, W, Cp), out_dtype),
        grid=(N, HB),
        in_specs=[pl.BlockSpec((1, TH, W, Cp), lambda n, h: (n, h, 0, 0)),
                  pl.BlockSpec((8, Cp), lambda n, h: (0, 0))],
        out_specs=pl.BlockSpec((1, TH, W, Cp), lambda n, h: (n, h, 0, 0)),
        compiler_params=pltpu.CompilerParams(
            dimension_semantics=("parallel", "parallel"),
            vmem_limit_bytes=_VMEM_LIMIT),
    )(y, params)

    # ---- glue: drop channel padding, NHWC -> NCHW (single fused XLA copy) ----
    out = out_nhwc[..., :Cout]
    return jnp.transpose(out, (0, 3, 1, 2))


def _reference_forward(x_nchw, conv_w, conv_b, bn_gamma, bn_beta):
    """Pure-JAX f32 reference (matches PyTorch ConvBlock in training mode)."""
    y = lax.conv_general_dilated(
        x_nchw, conv_w, window_strides=(1, 1), padding=((1, 1), (1, 1)),
        dimension_numbers=("NCHW", "OIHW", "NCHW"))
    y = y + conv_b[None, :, None, None]
    mean = jnp.mean(y, axis=(0, 2, 3), keepdims=True)
    var = jnp.mean((y - mean) ** 2, axis=(0, 2, 3), keepdims=True)  # biased
    y = (y - mean) / jnp.sqrt(var + BN_EPS)
    y = y * bn_gamma[None, :, None, None] + bn_beta[None, :, None, None]
    return jnp.maximum(y, 0.0)


if __name__ == "__main__":
    N, Cin, Cout, H, W = 2, 4, 8, 16, 16

    key = jax.random.PRNGKey(0)
    kx_, kw_, kb_ = jax.random.split(key, 3)

    x = jax.random.normal(kx_, (N, Cin, H, W), dtype=jnp.float32)

    # Deterministic synthetic parameters (shapes per nn.Conv2d / nn.BatchNorm2d).
    fan_in = Cin * 3 * 3
    conv_w = jax.random.normal(kw_, (Cout, Cin, 3, 3), dtype=jnp.float32) / jnp.sqrt(fan_in)
    conv_b = 0.1 * jax.random.normal(kb_, (Cout,), dtype=jnp.float32)
    bn_gamma = jnp.ones((Cout,), dtype=jnp.float32)   # PyTorch default init
    bn_beta = jnp.zeros((Cout,), dtype=jnp.float32)   # PyTorch default init

    fwd = jax.jit(conv_block_forward)
    out = jax.block_until_ready(fwd(x, conv_w, conv_b, bn_gamma, bn_beta))

    ref = _reference_forward(x, conv_w, conv_b, bn_gamma, bn_beta)
    assert out.shape == (N, Cout, H, W)
    # Tolerance reflects bf16 matmul operands + bf16 conv intermediate vs the
    # exact f32 reference (per perf review, accuracy/bandwidth tradeoff).
    assert jnp.allclose(out, ref, atol=5e-2, rtol=5e-2), "mismatch vs reference"

    print("KERNEL_OK")
</pallas_src>

<mosaic_0001>
module attributes {stable_mosaic.version = 11 : i64} {
  func.func @_conv_stats_kernel(%arg0: i32, %arg1: i32, %arg2: i32, %arg3: memref<1x16x18x4xbf16, #tpu.memory_space<vmem>>, %arg4: memref<1x1x18x4xbf16, #tpu.memory_space<vmem>>, %arg5: memref<1x1x18x4xbf16, #tpu.memory_space<vmem>>, %arg6: memref<9x4x128xbf16, #tpu.memory_space<vmem>>, %arg7: memref<1x16x16x128xbf16, #tpu.memory_space<vmem>>, %arg8: memref<8x128xf32, #tpu.memory_space<vmem>>, %arg9: memref<8x128xf32, #tpu.memory_space<vmem>>) attributes {dimension_semantics = [#tpu.dimension_semantics<parallel>, #tpu.dimension_semantics<arbitrary>, #tpu.dimension_semantics<arbitrary>], iteration_bounds = array<i64: 2, 1, 1>, scalar_prefetch = 0 : i64, scratch_operands = 0 : i64, tpu.core_type = #tpu.core_type<tc>, window_params = [{transform_indices = @transform_0, window_bounds = array<i64: 1, 16, 18, 4>}, {transform_indices = @transform_1, window_bounds = array<i64: 1, 1, 18, 4>}, {transform_indices = @transform_2, window_bounds = array<i64: 1, 1, 18, 4>}, {pipeline_mode = #tpu.pipeline_mode<synchronous>, transform_indices = @transform_3, window_bounds = array<i64: 9, 4, 128>}, {transform_indices = @transform_4, window_bounds = array<i64: 1, 16, 16, 128>}, {transform_indices = @transform_5, window_bounds = array<i64: 8, 128>}, {transform_indices = @transform_6, window_bounds = array<i64: 8, 128>}]} {
    %c0_i32 = arith.constant 0 : i32
    %0 = arith.cmpi eq, %arg1, %c0_i32 : i32
    %c0_i32_0 = arith.constant 0 : i32
    %1 = arith.cmpi eq, %arg2, %c0_i32_0 : i32
    %2 = arith.andi %0, %1 : i1
    %3 = arith.extui %2 : i1 to i32
    %c0_i32_1 = arith.constant 0 : i32
    %4 = arith.cmpi ne, %3, %c0_i32_1 : i32
    scf.if %4 {
      %cst_54 = arith.constant 0.000000e+00 : f32
      %80 = vector.broadcast %cst_54 : f32 to vector<8x128xf32>
      %c0_55 = arith.constant 0 : index
      %c0_56 = arith.constant 0 : index
      %81 = vector.load %arg8[%c0_55, %c0_56] : memref<8x128xf32, #tpu.memory_space<vmem>>, vector<8x128xf32>
      tpu.vector_store %arg8[%c0_55, %c0_56], %80 {strides = array<i32>} : memref<8x128xf32, #tpu.memory_space<vmem>>, vector<8x128xf32>,
      %cst_57 = arith.constant 0.000000e+00 : f32
      %82 = vector.broadcast %cst_57 : f32 to vector<8x128xf32>
      %c0_58 = arith.constant 0 : index
      %c0_59 = arith.constant 0 : index
      %83 = vector.load %arg9[%c0_58, %c0_59] : memref<8x128xf32, #tpu.memory_space<vmem>>, vector<8x128xf32>
      tpu.vector_store %arg9[%c0_58, %c0_59], %82 {strides = array<i32>} : memref<8x128xf32, #tpu.memory_space<vmem>>, vector<8x128xf32>,
    } else {
    }
    %c0 = arith.constant 0 : index
    %c0_2 = arith.constant 0 : index
    %c0_3 = arith.constant 0 : index
    %c0_4 = arith.constant 0 : index
    %5 = vector.load %arg3[%c0, %c0_2, %c0_3, %c0_4] : memref<1x16x18x4xbf16, #tpu.memory_space<vmem>>, vector<1x16x18x4xbf16>
    %6 = vector.shape_cast %5 : vector<1x16x18x4xbf16> to vector<16x18x4xbf16>
    %c0_5 = arith.constant 0 : index
    %c0_6 = arith.constant 0 : index
    %c0_7 = arith.constant 0 : index
    %c0_8 = arith.constant 0 : index
    %7 = vector.load %arg4[%c0_5, %c0_6, %c0_7, %c0_8] : memref<1x1x18x4xbf16, #tpu.memory_space<vmem>>, vector<1x1x18x4xbf16>
    %8 = vector.shape_cast %7 : vector<1x1x18x4xbf16> to vector<1x18x4xbf16>
    %c0_9 = arith.constant 0 : index
    %c0_10 = arith.constant 0 : index
    %c0_11 = arith.constant 0 : index
    %c0_12 = arith.constant 0 : index
    %9 = vector.load %arg5[%c0_9, %c0_10, %c0_11, %c0_12] : memref<1x1x18x4xbf16, #tpu.memory_space<vmem>>, vector<1x1x18x4xbf16>
    %10 = vector.shape_cast %9 : vector<1x1x18x4xbf16> to vector<1x18x4xbf16>
    %11 = tpu.concatenate %6, %8, %10 in 0 : vector<16x18x4xbf16>, vector<1x18x4xbf16>, vector<1x18x4xbf16> -> vector<18x18x4xbf16>
    %12 = vector.extract_strided_slice %11 {offsets = [0, 0, 0], sizes = [16, 16, 4], strides = [1, 1, 1]} : vector<18x18x4xbf16> to vector<16x16x4xbf16>
    %13 = vector.shape_cast %12 : vector<16x16x4xbf16> to vector<256x4xbf16>
    %c0_13 = arith.constant 0 : index
    %c0_14 = arith.constant 0 : index
    %c0_15 = arith.constant 0 : index
    %14 = vector.load %arg6[%c0_13, %c0_14, %c0_15] : memref<9x4x128xbf16, #tpu.memory_space<vmem>>, vector<1x4x128xbf16>
    %15 = vector.shape_cast %14 : vector<1x4x128xbf16> to vector<4x128xbf16>
    %cst = arith.constant dense<0.000000e+00> : vector<256x128xf32>
    %16 = tpu.matmul %13, %15, %cst {dimension_numbers = #tpu.dot_dimension_numbers<[1], [0], [0], [1], [0, 0, 1, 1], [], []>} : vector<256x4xbf16>, vector<4x128xbf16>, vector<256x128xf32> -> vector<256x128xf32>
    %17 = vector.extract_strided_slice %11 {offsets = [0, 1, 0], sizes = [16, 16, 4], strides = [1, 1, 1]} : vector<18x18x4xbf16> to vector<16x16x4xbf16>
    %18 = vector.shape_cast %17 : vector<16x16x4xbf16> to vector<256x4xbf16>
    %c1 = arith.constant 1 : index
    %c0_16 = arith.constant 0 : index
    %c0_17 = arith.constant 0 : index
    %19 = vector.load %arg6[%c1, %c0_16, %c0_17] : memref<9x4x128xbf16, #tpu.memory_space<vmem>>, vector<1x4x128xbf16>
    %20 = vector.shape_cast %19 : vector<1x4x128xbf16> to vector<4x128xbf16>
    %cst_18 = arith.constant dense<0.000000e+00> : vector<256x128xf32>
    %21 = tpu.matmul %18, %20, %cst_18 {dimension_numbers = #tpu.dot_dimension_numbers<[1], [0], [0], [1], [0, 0, 1, 1], [], []>} : vector<256x4xbf16>, vector<4x128xbf16>, vector<256x128xf32> -> vector<256x128xf32>
    %22 = arith.addf %16, %21 : vector<256x128xf32>
    %23 = vector.extract_strided_slice %11 {offsets = [0, 2, 0], sizes = [16, 16, 4], strides = [1, 1, 1]} : vector<18x18x4xbf16> to vector<16x16x4xbf16>
    %24 = vector.shape_cast %23 : vector<16x16x4xbf16> to vector<256x4xbf16>
    %c2 = arith.constant 2 : index
    %c0_19 = arith.constant 0 : index
    %c0_20 = arith.constant 0 : index
    %25 = vector.load %arg6[%c2, %c0_19, %c0_20] : memref<9x4x128xbf16, #tpu.memory_space<vmem>>, vector<1x4x128xbf16>
    %26 = vector.shape_cast %25 : vector<1x4x128xbf16> to vector<4x128xbf16>
    %cst_21 = arith.constant dense<0.000000e+00> : vector<256x128xf32>
    %27 = tpu.matmul %24, %26, %cst_21 {dimension_numbers = #tpu.dot_dimension_numbers<[1], [0], [0], [1], [0, 0, 1, 1], [], []>} : vector<256x4xbf16>, vector<4x128xbf16>, vector<256x128xf32> -> vector<256x128xf32>
    %28 = arith.addf %22, %27 : vector<256x128xf32>
    %29 = vector.extract_strided_slice %11 {offsets = [1, 0, 0], sizes = [16, 16, 4], strides = [1, 1, 1]} : vector<18x18x4xbf16> to vector<16x16x4xbf16>
    %30 = vector.shape_cast %29 : vector<16x16x4xbf16> to vector<256x4xbf16>
    %c3 = arith.constant 3 : index
    %c0_22 = arith.constant 0 : index
    %c0_23 = arith.constant 0 : index
    %31 = vector.load %arg6[%c3, %c0_22, %c0_23] : memref<9x4x128xbf16, #tpu.memory_space<vmem>>, vector<1x4x128xbf16>
    %32 = vector.shape_cast %31 : vector<1x4x128xbf16> to vector<4x128xbf16>
    %cst_24 = arith.constant dense<0.000000e+00> : vector<256x128xf32>
    %33 = tpu.matmul %30, %32, %cst_24 {dimension_numbers = #tpu.dot_dimension_numbers<[1], [0], [0], [1], [0, 0, 1, 1], [], []>} : vector<256x4xbf16>, vector<4x128xbf16>, vector<256x128xf32> -> vector<256x128xf32>
    %34 = arith.addf %28, %33 : vector<256x128xf32>
    %35 = vector.extract_strided_slice %11 {offsets = [1, 1, 0], sizes = [16, 16, 4], strides = [1, 1, 1]} : vector<18x18x4xbf16> to vector<16x16x4xbf16>
    %36 = vector.shape_cast %35 : vector<16x16x4xbf16> to vector<256x4xbf16>
    %c4 = arith.constant 4 : index
    %c0_25 = arith.constant 0 : index
    %c0_26 = arith.constant 0 : index
    %37 = vector.load %arg6[%c4, %c0_25, %c0_26] : memref<9x4x128xbf16, #tpu.memory_space<vmem>>, vector<1x4x128xbf16>
    %38 = vector.shape_cast %37 : vector<1x4x128xbf16> to vector<4x128xbf16>
    %cst_27 = arith.constant dense<0.000000e+00> : vector<256x128xf32>
    %39 = tpu.matmul %36, %38, %cst_27 {dimension_numbers = #tpu.dot_dimension_numbers<[1], [0], [0], [1], [0, 0, 1, 1], [], []>} : vector<256x4xbf16>, vector<4x128xbf16>, vector<256x128xf32> -> vector<256x128xf32>
    %40 = arith.addf %34, %39 : vector<256x128xf32>
    %41 = vector.extract_strided_slice %11 {offsets = [1, 2, 0], sizes = [16, 16, 4], strides = [1, 1, 1]} : vector<18x18x4xbf16> to vector<16x16x4xbf16>
    %42 = vector.shape_cast %41 : vector<16x16x4xbf16> to vector<256x4xbf16>
    %c5 = arith.constant 5 : index
    %c0_28 = arith.constant 0 : index
    %c0_29 = arith.constant 0 : index
    %43 = vector.load %arg6[%c5, %c0_28, %c0_29] : memref<9x4x128xbf16, #tpu.memory_space<vmem>>, vector<1x4x128xbf16>
    %44 = vector.shape_cast %43 : vector<1x4x128xbf16> to vector<4x128xbf16>
    %cst_30 = arith.constant dense<0.000000e+00> : vector<256x128xf32>
    %45 = tpu.matmul %42, %44, %cst_30 {dimension_numbers = #tpu.dot_dimension_numbers<[1], [0], [0], [1], [0, 0, 1, 1], [], []>} : vector<256x4xbf16>, vector<4x128xbf16>, vector<256x128xf32> -> vector<256x128xf32>
    %46 = arith.addf %40, %45 : vector<256x128xf32>
    %47 = vector.extract_strided_slice %11 {offsets = [2, 0, 0], sizes = [16, 16, 4], strides = [1, 1, 1]} : vector<18x18x4xbf16> to vector<16x16x4xbf16>
    %48 = vector.shape_cast %47 : vector<16x16x4xbf16> to vector<256x4xbf16>
    %c6 = arith.constant 6 : index
    %c0_31 = arith.constant 0 : index
    %c0_32 = arith.constant 0 : index
    %49 = vector.load %arg6[%c6, %c0_31, %c0_32] : memref<9x4x128xbf16, #tpu.memory_space<vmem>>, vector<1x4x128xbf16>
    %50 = vector.shape_cast %49 : vector<1x4x128xbf16> to vector<4x128xbf16>
    %cst_33 = arith.constant dense<0.000000e+00> : vector<256x128xf32>
    %51 = tpu.matmul %48, %50, %cst_33 {dimension_numbers = #tpu.dot_dimension_numbers<[1], [0], [0], [1], [0, 0, 1, 1], [], []>} : vector<256x4xbf16>, vector<4x128xbf16>, vector<256x128xf32> -> vector<256x128xf32>
    %52 = arith.addf %46, %51 : vector<256x128xf32>
    %53 = vector.extract_strided_slice %11 {offsets = [2, 1, 0], sizes = [16, 16, 4], strides = [1, 1, 1]} : vector<18x18x4xbf16> to vector<16x16x4xbf16>
    %54 = vector.shape_cast %53 : vector<16x16x4xbf16> to vector<256x4xbf16>
    %c7 = arith.constant 7 : index
    %c0_34 = arith.constant 0 : index
    %c0_35 = arith.constant 0 : index
    %55 = vector.load %arg6[%c7, %c0_34, %c0_35] : memref<9x4x128xbf16, #tpu.memory_space<vmem>>, vector<1x4x128xbf16>
    %56 = vector.shape_cast %55 : vector<1x4x128xbf16> to vector<4x128xbf16>
    %cst_36 = arith.constant dense<0.000000e+00> : vector<256x128xf32>
    %57 = tpu.matmul %54, %56, %cst_36 {dimension_numbers = #tpu.dot_dimension_numbers<[1], [0], [0], [1], [0, 0, 1, 1], [], []>} : vector<256x4xbf16>, vector<4x128xbf16>, vector<256x128xf32> -> vector<256x128xf32>
    %58 = arith.addf %52, %57 : vector<256x128xf32>
    %59 = vector.extract_strided_slice %11 {offsets = [2, 2, 0], sizes = [16, 16, 4], strides = [1, 1, 1]} : vector<18x18x4xbf16> to vector<16x16x4xbf16>
    %60 = vector.shape_cast %59 : vector<16x16x4xbf16> to vector<256x4xbf16>
    %c8 = arith.constant 8 : index
    %c0_37 = arith.constant 0 : index
    %c0_38 = arith.constant 0 : index
    %61 = vector.load %arg6[%c8, %c0_37, %c0_38] : memref<9x4x128xbf16, #tpu.memory_space<vmem>>, vector<1x4x128xbf16>
    %62 = vector.shape_cast %61 : vector<1x4x128xbf16> to vector<4x128xbf16>
    %cst_39 = arith.constant dense<0.000000e+00> : vector<256x128xf32>
    %63 = tpu.matmul %60, %62, %cst_39 {dimension_numbers = #tpu.dot_dimension_numbers<[1], [0], [0], [1], [0, 0, 1, 1], [], []>} : vector<256x4xbf16>, vector<4x128xbf16>, vector<256x128xf32> -> vector<256x128xf32>
    %64 = arith.addf %58, %63 : vector<256x128xf32>
    %65 = vector.shape_cast %64 : vector<256x128xf32> to vector<16x16x128xf32>
    %66 = arith.truncf %65 : vector<16x16x128xf32> to vector<16x16x128xbf16>
    %c0_40 = arith.constant 0 : index
    %c0_41 = arith.constant 0 : index
    %c0_42 = arith.constant 0 : index
    %c0_43 = arith.constant 0 : index
    %67 = vector.load %arg7[%c0_40, %c0_41, %c0_42, %c0_43] : memref<1x16x16x128xbf16, #tpu.memory_space<vmem>>, vector<1x16x16x128xbf16>
    %68 = vector.shape_cast %67 : vector<1x16x16x128xbf16> to vector<16x16x128xbf16>
    %69 = vector.shape_cast %66 : vector<16x16x128xbf16> to vector<1x16x16x128xbf16>
    tpu.vector_store %arg7[%c0_40, %c0_41, %c0_42, %c0_43], %69 {strides = array<i32>} : memref<1x16x16x128xbf16, #tpu.memory_space<vmem>>, vector<1x16x16x128xbf16>,
    %70 = vector.shape_cast %64 : vector<256x128xf32> to vector<32x8x128xf32>
    %c0_44 = arith.constant 0 : index
    %c0_45 = arith.constant 0 : index
    %71 = vector.load %arg8[%c0_44, %c0_45] : memref<8x128xf32, #tpu.memory_space<vmem>>, vector<8x128xf32>
    %cst_46 = arith.constant dense<0.000000e+00> : vector<8x128xf32>
    %72 = vector.multi_reduction <add>, %70, %cst_46 [0] : vector<32x8x128xf32> to vector<8x128xf32>
    %73 = arith.addf %71, %72 : vector<8x128xf32>
    %c0_47 = arith.constant 0 : index
    %c0_48 = arith.constant 0 : index
    %74 = vector.load %arg8[%c0_47, %c0_48] : memref<8x128xf32, #tpu.memory_space<vmem>>, vector<8x128xf32>
    tpu.vector_store %arg8[%c0_47, %c0_48], %73 {strides = array<i32>} : memref<8x128xf32, #tpu.memory_space<vmem>>, vector<8x128xf32>,
    %c0_49 = arith.constant 0 : index
    %c0_50 = arith.constant 0 : index
    %75 = vector.load %arg9[%c0_49, %c0_50] : memref<8x128xf32, #tpu.memory_space<vmem>>, vector<8x128xf32>
    %76 = arith.mulf %70, %70 : vector<32x8x128xf32>
    %cst_51 = arith.constant dense<0.000000e+00> : vector<8x128xf32>
    %77 = vector.multi_reduction <add>, %76, %cst_51 [0] : vector<32x8x128xf32> to vector<8x128xf32>
    %78 = arith.addf %75, %77 : vector<8x128xf32>
    %c0_52 = arith.constant 0 : index
    %c0_53 = arith.constant 0 : index
    %79 = vector.load %arg9[%c0_52, %c0_53] : memref<8x128xf32, #tpu.memory_space<vmem>>, vector<8x128xf32>
    tpu.vector_store %arg9[%c0_52, %c0_53], %78 {strides = array<i32>} : memref<8x128xf32, #tpu.memory_space<vmem>>, vector<8x128xf32>,
    return
  }
  func.func @transform_0(%arg0: i32, %arg1: i32, %arg2: i32) -> (i32, i32, i32, i32) {
    %c1_i32 = arith.constant 1 : i32
    %0 = arith.muli %arg0, %c1_i32 : i32
    %1 = arith.addi %0, %arg1 : i32
    %c0_i32 = arith.constant 0 : i32
    %c0_i32_0 = arith.constant 0 : i32
    %c0_i32_1 = arith.constant 0 : i32
    return %1, %arg2, %c0_i32, %c0_i32_0 : i32, i32, i32, i32
  }
  func.func @transform_1(%arg0: i32, %arg1: i32, %arg2: i32) -> (i32, i32, i32, i32) {
    %c1_i32 = arith.constant 1 : i32
    %0 = arith.muli %arg0, %c1_i32 : i32
    %1 = arith.addi %0, %arg1 : i32
    %c1_i32_0 = arith.constant 1 : i32
    %2 = arith.addi %arg2, %c1_i32_0 : i32
    %c16_i32 = arith.constant 16 : i32
    %3 = arith.muli %2, %c16_i32 : i32
    %c0_i32 = arith.constant 0 : i32
    %c0_i32_1 = arith.constant 0 : i32
    %c0_i32_2 = arith.constant 0 : i32
    return %1, %3, %c0_i32, %c0_i32_1 : i32, i32, i32, i32
  }
  func.func @transform_2(%arg0: i32, %arg1: i32, %arg2: i32) -> (i32, i32, i32, i32) {
    %c1_i32 = arith.constant 1 : i32
    %0 = arith.muli %arg0, %c1_i32 : i32
    %1 = arith.addi %0, %arg1 : i32
    %c1_i32_0 = arith.constant 1 : i32
    %2 = arith.addi %arg2, %c1_i32_0 : i32
    %c16_i32 = arith.constant 16 : i32
    %3 = arith.muli %2, %c16_i32 : i32
    %c1_i32_1 = arith.constant 1 : i32
    %4 = arith.addi %3, %c1_i32_1 : i32
    %c0_i32 = arith.constant 0 : i32
    %c0_i32_2 = arith.constant 0 : i32
    %c0_i32_3 = arith.constant 0 : i32
    return %1, %4, %c0_i32, %c0_i32_2 : i32, i32, i32, i32
  }
  func.func @transform_3(%arg0: i32, %arg1: i32, %arg2: i32) -> (i32, i32, i32) {
    %c0_i32 = arith.constant 0 : i32
    %c0_i32_0 = arith.constant 0 : i32
    %c0_i32_1 = arith.constant 0 : i32
    %c0_i32_2 = arith.constant 0 : i32
    return %c0_i32, %c0_i32_0, %c0_i32_1 : i32, i32, i32
  }
  func.func @transform_4(%arg0: i32, %arg1: i32, %arg2: i32) -> (i32, i32, i32, i32) {
    %c1_i32 = arith.constant 1 : i32
    %0 = arith.muli %arg0, %c1_i32 : i32
    %1 = arith.addi %0, %arg1 : i32
    %c0_i32 = arith.constant 0 : i32
    %c0_i32_0 = arith.constant 0 : i32
    %c0_i32_1 = arith.constant 0 : i32
    return %1, %arg2, %c0_i32, %c0_i32_0 : i32, i32, i32, i32
  }
  func.func @transform_5(%arg0: i32, %arg1: i32, %arg2: i32) -> (i32, i32) {
    %c0_i32 = arith.constant 0 : i32
    %c0_i32_0 = arith.constant 0 : i32
    return %arg0, %c0_i32 : i32, i32
  }
  func.func @transform_6(%arg0: i32, %arg1: i32, %arg2: i32) -> (i32, i32) {
    %c0_i32 = arith.constant 0 : i32
    %c0_i32_0 = arith.constant 0 : i32
    return %arg0, %c0_i32 : i32, i32
  }
}

module attributes {stable_mosaic.version = 11 : i64} {
  func.func @_bn_relu_kernel(%arg0: i32, %arg1: i32, %arg2: memref<1x16x16x128xbf16, #tpu.memory_space<vmem>>, %arg3: memref<8x128xf32, #tpu.memory_space<vmem>>, %arg4: memref<1x16x16x128xf32, #tpu.memory_space<vmem>>) attributes {dimension_semantics = [#tpu.dimension_semantics<parallel>, #tpu.dimension_semantics<parallel>], iteration_bounds = array<i64: 2, 1>, scalar_prefetch = 0 : i64, scratch_operands = 0 : i64, tpu.core_type = #tpu.core_type<tc>, window_params = [{transform_indices = @transform_0, window_bounds = array<i64: 1, 16, 16, 128>}, {pipeline_mode = #tpu.pipeline_mode<synchronous>, transform_indices = @transform_1, window_bounds = array<i64: 8, 128>}, {transform_indices = @transform_2, window_bounds = array<i64: 1, 16, 16, 128>}]} {
    %c0 = arith.constant 0 : index
    %c0_0 = arith.constant 0 : index
    %0 = vector.load %arg3[%c0, %c0_0] : memref<8x128xf32, #tpu.memory_space<vmem>>, vector<1x128xf32>
    %c1 = arith.constant 1 : index
    %c0_1 = arith.constant 0 : index
    %1 = vector.load %arg3[%c1, %c0_1] : memref<8x128xf32, #tpu.memory_space<vmem>>, vector<1x128xf32>
    %c0_2 = arith.constant 0 : index
    %c0_3 = arith.constant 0 : index
    %c0_4 = arith.constant 0 : index
    %c0_5 = arith.constant 0 : index
    %2 = vector.load %arg2[%c0_2, %c0_3, %c0_4, %c0_5] : memref<1x16x16x128xbf16, #tpu.memory_space<vmem>>, vector<1x16x16x128xbf16>
    %3 = arith.extf %2 : vector<1x16x16x128xbf16> to vector<1x16x16x128xf32>
    %4 = vector.shape_cast %0 : vector<1x128xf32> to vector<1x1x1x128xf32>
    %5 = vector.broadcast %4 : vector<1x1x1x128xf32> to vector<1x16x16x128xf32>
    %6 = arith.mulf %3, %5 : vector<1x16x16x128xf32>
    %7 = vector.shape_cast %1 : vector<1x128xf32> to vector<1x1x1x128xf32>
    %8 = vector.broadcast %7 : vector<1x1x1x128xf32> to vector<1x16x16x128xf32>
    %9 = arith.addf %6, %8 : vector<1x16x16x128xf32>
    %cst = arith.constant 0.000000e+00 : f32
    %10 = vector.broadcast %cst : f32 to vector<1x16x16x128xf32>
    %11 = arith.maximumf %9, %10 : vector<1x16x16x128xf32>
    %c0_6 = arith.constant 0 : index
    %c0_7 = arith.constant 0 : index
    %c0_8 = arith.constant 0 : index
    %c0_9 = arith.constant 0 : index
    %12 = vector.load %arg4[%c0_6, %c0_7, %c0_8, %c0_9] : memref<1x16x16x128xf32, #tpu.memory_space<vmem>>, vector<1x16x16x128xf32>
    tpu.vector_store %arg4[%c0_6, %c0_7, %c0_8, %c0_9], %11 {strides = array<i32>} : memref<1x16x16x128xf32, #tpu.memory_space<vmem>>, vector<1x16x16x128xf32>,
    return
  }
  func.func @transform_0(%arg0: i32, %arg1: i32) -> (i32, i32, i32, i32) {
    %c0_i32 = arith.constant 0 : i32
    %c0_i32_0 = arith.constant 0 : i32
    %c0_i32_1 = arith.constant 0 : i32
    return %arg0, %arg1, %c0_i32, %c0_i32_0 : i32, i32, i32, i32
  }
  func.func @transform_1(%arg0: i32, %arg1: i32) -> (i32, i32) {
    %c0_i32 = arith.constant 0 : i32
    %c0_i32_0 = arith.constant 0 : i32
    %c0_i32_1 = arith.constant 0 : i32
    return %c0_i32, %c0_i32_0 : i32, i32
  }
  func.func @transform_2(%arg0: i32, %arg1: i32) -> (i32, i32, i32, i32) {
    %c0_i32 = arith.constant 0 : i32
    %c0_i32_0 = arith.constant 0 : i32
    %c0_i32_1 = arith.constant 0 : i32
    return %arg0, %arg1, %c0_i32, %c0_i32_0 : i32, i32, i32, i32
  }
}

</mosaic_0001>

<bundles_post_ra>
// kernel: conv_block_forward.3
= control target key start
LH: loop header
LB: loop body
LE: loop exit
PB: predicated region body
PF: predicated region fallthrough
CT: control target
= control target key end

     0   :  { %s637_s9 = smov 0   ;;  %s639_s10 = smov 0   ;;  %s800_s0 = inlined_call_operand.vmem [shape: bf16[2,16,16,128], index: 0, kind: input, shape index: {}]   ;;  %s801_s1 = inlined_call_operand.vmem [shape: f32[8,128], index: 1, kind: input, shape index: {}]   ;;  %s802_s2 = inlined_call_operand.vmem [shape: f32[2,16,16,128], index: 2, kind: output, shape index: {}]  }
   0x1   :  { %s641_s11 = smov 0  }
   0x2 LB: > { %s24_s12 = sadd.s32 1, %s616_s10  ;;  %p484_p0 = scmp.ge.s32.totalorder %s620_s11, 1  ;;  %s620_s11 = sphi %s641_s11, %s12_s11   ;;  %s616_s10 = sphi %s639_s10, %s804_s10   ;;  %s612_s9 = sphi %s637_s9, %s803_s9  }
   0x3   : > { %p26_p1 = scmp.ge.s32.totalorder %s24_s12, 2  ;;  %p134_p2 = scmp.lt.s32.totalorder %s620_s11, 3 }
   0x5   : > { %s806_s12 = smov (%p26_p1, %s24_s12), 0  ;;  %p135_p3 = pnand %p484_p0, %p134_p2 }
   0x6   : > { %p167_p4 = scmp.lt.s32.totalorder (!%p135_p3), %s612_s9, 1 }
   0x7   : > { %138 = sbr.rel (%p135_p3) target bundleno = 56 (0x38), region = 28 }
   0xc   : > { %s808_s9 = smov (!%p167_p4, %s612_s9), 1  ;;  %v666_v0 = vld [vmem:[%s801_s1] ss:$0 sm:$0xff]  ;;  %v674_v5 = vld [vmem:[%s801_s1 + $0x1] ss:$0 sm:$0xff] }
   0xd   : > { %s491_s13 = sshll.u32 %s808_s9, 7  ;;  %s492_s21 = sshll.u32 %s808_s9, 8 }
   0xe   : > { %s661_s16 = scalar_lea.vmem %s800_s0, %s491_s13  ;;  %s693_s24 = scalar_lea.vmem %s802_s2, %s492_s21 }
   0xf   : > { %v494_v1 = vld [vmem:[%s661_s16] sm:$0xff]   ;;  %v557_v2 = vld [vmem:[%s661_s16 + $0x8] sm:$0xff]   ;;  %v558_v3 = vld [vmem:[%s661_s16 + $0x10] sm:$0xff]  }
  0x10   : > { %v495_v4 = vunpack.c.l.bf16 %v494_v1  ;;  %v496_v6 = vunpack.c.h.bf16 %v494_v1  ;;  %v499_v7 = vunpack.c.l.bf16 %v557_v2  ;;  %v500_v8 = vunpack.c.h.bf16 %v557_v2  ;;  %v559_v9 = vld [vmem:[%s661_s16 + $0x18] sm:$0xff]   ;;  %v560_v30 = vld [vmem:[%s661_s16 + $0x20] sm:$0xff]   ;;  %v561_v31 = vld [vmem:[%s661_s16 + $0x28] sm:$0xff]  }
  0x11   : > { %v503_v10 = vunpack.c.l.bf16 %v558_v3  ;;  %v504_v11 = vunpack.c.h.bf16 %v558_v3  ;;  %v507_v12 = vunpack.c.l.bf16 %v559_v9  ;;  %v508_v13 = vunpack.c.h.bf16 %v559_v9  ;;  %v562_v36 = vld [vmem:[%s661_s16 + $0x30] sm:$0xff]   ;;  %v563_v37 = vld [vmem:[%s661_s16 + $0x38] sm:$0xff]   ;;  %v564_v3 = vld [vmem:[%s661_s16 + $0x40] sm:$0xff]  }
  0x12   : > { %v255_v14 = vmul.f32 %v666_v0, %v495_v4  ;;  %v256_v15 = vmul.f32 %v666_v0, %v496_v6  ;;  %v257_v16 = vmul.f32 %v666_v0, %v499_v7  ;;  %v258_v17 = vmul.f32 %v666_v0, %v500_v8  ;;  %v565_v4 = vld [vmem:[%s661_s16 + $0x48] sm:$0xff]   ;;  %v566_v6 = vld [vmem:[%s661_s16 + $0x50] sm:$0xff]  }
  0x13   : > { %v259_v18 = vmul.f32 %v666_v0, %v503_v10  ;;  %v260_v19 = vmul.f32 %v666_v0, %v504_v11  ;;  %v261_v20 = vmul.f32 %v666_v0, %v507_v12  ;;  %v262_v21 = vmul.f32 %v666_v0, %v508_v13  ;;  %v567_v11 = vld [vmem:[%s661_s16 + $0x58] sm:$0xff]  }
  0x14   : > { %v288_v22 = vadd.f32 %v674_v5, %v255_v14  ;;  %v289_v23 = vadd.f32 %v674_v5, %v256_v15  ;;  %v290_v24 = vadd.f32 %v674_v5, %v257_v16  ;;  %v291_v25 = vadd.f32 %v674_v5, %v258_v17 }
  0x15   : > { %v292_v26 = vadd.f32 %v674_v5, %v259_v18  ;;  %v293_v27 = vadd.f32 %v674_v5, %v260_v19  ;;  %v294_v28 = vadd.f32 %v674_v5, %v261_v20  ;;  %v295_v29 = vadd.f32 %v674_v5, %v262_v21 }
  0x16   : > { %v320_v32 = vmax.f32 %v288_v22, 0.0  ;;  %v321_v33 = vmax.f32 %v289_v23, 0.0  ;;  %v322_v34 = vmax.f32 %v290_v24, 0.0  ;;  %v323_v35 = vmax.f32 %v291_v25, 0.0 }
  0x17   : > { %v324_v38 = vmax.f32 %v292_v26, 0.0  ;;  %v325_v39 = vmax.f32 %v293_v27, 0.0  ;;  %v326_v40 = vmax.f32 %v294_v28, 0.0  ;;  %v327_v41 = vmax.f32 %v295_v29, 0.0 }
  0x18   : > { %352 = vst [vmem:[%s693_s24] sm:$0xff] %v320_v32  ;;  %v511_v42 = vunpack.c.l.bf16 %v560_v30  ;;  %v512_v43 = vunpack.c.h.bf16 %v560_v30  ;;  %v515_v44 = vunpack.c.l.bf16 %v561_v31  ;;  %v516_v45 = vunpack.c.h.bf16 %v561_v31 }
  0x19   : > { %353 = vst [vmem:[%s693_s24 + $0x8] sm:$0xff] %v321_v33  ;;  %v519_v46 = vunpack.c.l.bf16 %v562_v36  ;;  %v520_v47 = vunpack.c.h.bf16 %v562_v36  ;;  %v523_v48 = vunpack.c.l.bf16 %v563_v37  ;;  %v524_v49 = vunpack.c.h.bf16 %v563_v37 }
  0x1a   : > { %354 = vst [vmem:[%s693_s24 + $0x10] sm:$0xff] %v322_v34  ;;  %v263_v50 = vmul.f32 %v666_v0, %v511_v42  ;;  %v264_v51 = vmul.f32 %v666_v0, %v512_v43  ;;  %v265_v52 = vmul.f32 %v666_v0, %v515_v44  ;;  %v266_v53 = vmul.f32 %v666_v0, %v516_v45  ;;  %v570_v42 = vld [vmem:[%s661_s16 + $0x70] sm:$0xff]  }
  0x1b   : > { %355 = vst [vmem:[%s693_s24 + $0x18] sm:$0xff] %v323_v35  ;;  %v267_v54 = vmul.f32 %v666_v0, %v519_v46  ;;  %v268_v55 = vmul.f32 %v666_v0, %v520_v47  ;;  %v269_v56 = vmul.f32 %v666_v0, %v523_v48  ;;  %v270_v57 = vmul.f32 %v666_v0, %v524_v49  ;;  %v571_v47 = vld [vmem:[%s661_s16 + $0x78] sm:$0xff]  }
  0x1c   : > { %356 = vst [vmem:[%s693_s24 + $0x20] sm:$0xff] %v324_v38  ;;  %v296_v58 = vadd.f32 %v674_v5, %v263_v50  ;;  %v297_v59 = vadd.f32 %v674_v5, %v264_v51  ;;  %v298_v60 = vadd.f32 %v674_v5, %v265_v52  ;;  %v299_v61 = vadd.f32 %v674_v5, %v266_v53 }
  0x1d   : > { %357 = vst [vmem:[%s693_s24 + $0x28] sm:$0xff] %v325_v39  ;;  %v300_v62 = vadd.f32 %v674_v5, %v267_v54  ;;  %v301_v63 = vadd.f32 %v674_v5, %v268_v55  ;;  %v302_v1 = vadd.f32 %v674_v5, %v269_v56  ;;  %v303_v2 = vadd.f32 %v674_v5, %v270_v57 }
  0x1e   : > { %358 = vst [vmem:[%s693_s24 + $0x30] sm:$0xff] %v326_v40  ;;  %v328_v7 = vmax.f32 %v296_v58, 0.0  ;;  %v329_v8 = vmax.f32 %v297_v59, 0.0  ;;  %v330_v9 = vmax.f32 %v298_v60, 0.0  ;;  %v331_v10 = vmax.f32 %v299_v61, 0.0  ;;  %v568_v40 = vld [vmem:[%s661_s16 + $0x60] sm:$0xff]  }
  0x1f   : > { %359 = vst [vmem:[%s693_s24 + $0x38] sm:$0xff] %v327_v41  ;;  %v332_v12 = vmax.f32 %v300_v62, 0.0  ;;  %v333_v13 = vmax.f32 %v301_v63, 0.0  ;;  %v334_v14 = vmax.f32 %v302_v1, 0.0  ;;  %v335_v15 = vmax.f32 %v303_v2, 0.0  ;;  %v569_v41 = vld [vmem:[%s661_s16 + $0x68] sm:$0xff]  }
  0x20   : > { %360 = vst [vmem:[%s693_s24 + $0x40] sm:$0xff] %v328_v7  ;;  %v527_v16 = vunpack.c.l.bf16 %v564_v3  ;;  %v528_v17 = vunpack.c.h.bf16 %v564_v3  ;;  %v531_v18 = vunpack.c.l.bf16 %v565_v4  ;;  %v532_v19 = vunpack.c.h.bf16 %v565_v4 }
  0x21   : > { %361 = vst [vmem:[%s693_s24 + $0x48] sm:$0xff] %v329_v8  ;;  %v535_v20 = vunpack.c.l.bf16 %v566_v6  ;;  %v536_v21 = vunpack.c.h.bf16 %v566_v6  ;;  %v539_v22 = vunpack.c.l.bf16 %v567_v11  ;;  %v540_v23 = vunpack.c.h.bf16 %v567_v11 }
  0x22   : > { %362 = vst [vmem:[%s693_s24 + $0x50] sm:$0xff] %v330_v9  ;;  %v271_v24 = vmul.f32 %v666_v0, %v527_v16  ;;  %v272_v25 = vmul.f32 %v666_v0, %v528_v17  ;;  %v273_v26 = vmul.f32 %v666_v0, %v531_v18  ;;  %v274_v27 = vmul.f32 %v666_v0, %v532_v19 }
  0x23   : > { %363 = vst [vmem:[%s693_s24 + $0x58] sm:$0xff] %v331_v10  ;;  %v275_v28 = vmul.f32 %v666_v0, %v535_v20  ;;  %v276_v29 = vmul.f32 %v666_v0, %v536_v21  ;;  %v277_v30 = vmul.f32 %v666_v0, %v539_v22  ;;  %v278_v31 = vmul.f32 %v666_v0, %v540_v23 }
  0x24   : > { %364 = vst [vmem:[%s693_s24 + $0x60] sm:$0xff] %v332_v12  ;;  %v304_v32 = vadd.f32 %v674_v5, %v271_v24  ;;  %v305_v33 = vadd.f32 %v674_v5, %v272_v25  ;;  %v306_v34 = vadd.f32 %v674_v5, %v273_v26  ;;  %v307_v35 = vadd.f32 %v674_v5, %v274_v27 }
  0x25   : > { %365 = vst [vmem:[%s693_s24 + $0x68] sm:$0xff] %v333_v13  ;;  %v308_v36 = vadd.f32 %v674_v5, %v275_v28  ;;  %v309_v37 = vadd.f32 %v674_v5, %v276_v29  ;;  %v310_v38 = vadd.f32 %v674_v5, %v277_v30  ;;  %v311_v39 = vadd.f32 %v674_v5, %v278_v31 }
  0x26   : > { %366 = vst [vmem:[%s693_s24 + $0x70] sm:$0xff] %v334_v14  ;;  %v336_v43 = vmax.f32 %v304_v32, 0.0  ;;  %v337_v44 = vmax.f32 %v305_v33, 0.0  ;;  %v338_v45 = vmax.f32 %v306_v34, 0.0  ;;  %v339_v46 = vmax.f32 %v307_v35, 0.0 }
  0x27   : > { %367 = vst [vmem:[%s693_s24 + $0x78] sm:$0xff] %v335_v15  ;;  %v340_v48 = vmax.f32 %v308_v36, 0.0  ;;  %v341_v49 = vmax.f32 %v309_v37, 0.0  ;;  %v342_v50 = vmax.f32 %v310_v38, 0.0  ;;  %v343_v51 = vmax.f32 %v311_v39, 0.0 }
  0x28   : > { %368 = vst [vmem:[%s693_s24 + $0x80] sm:$0xff] %v336_v43  ;;  %v543_v52 = vunpack.c.l.bf16 %v568_v40  ;;  %v544_v53 = vunpack.c.h.bf16 %v568_v40  ;;  %v547_v54 = vunpack.c.l.bf16 %v569_v41  ;;  %v548_v55 = vunpack.c.h.bf16 %v569_v41 }
  0x29   : > { %369 = vst [vmem:[%s693_s24 + $0x88] sm:$0xff] %v337_v44  ;;  %v551_v56 = vunpack.c.l.bf16 %v570_v42  ;;  %v552_v57 = vunpack.c.h.bf16 %v570_v42  ;;  %v555_v58 = vunpack.c.l.bf16 %v571_v47  ;;  %v556_v59 = vunpack.c.h.bf16 %v571_v47 }
  0x2a   : > { %370 = vst [vmem:[%s693_s24 + $0x90] sm:$0xff] %v338_v45  ;;  %v279_v60 = vmul.f32 %v666_v0, %v543_v52  ;;  %v280_v61 = vmul.f32 %v666_v0, %v544_v53  ;;  %v281_v62 = vmul.f32 %v666_v0, %v547_v54  ;;  %v282_v63 = vmul.f32 %v666_v0, %v548_v55 }
  0x2b   : > { %371 = vst [vmem:[%s693_s24 + $0x98] sm:$0xff] %v339_v46  ;;  %v283_v1 = vmul.f32 %v666_v0, %v551_v56  ;;  %v284_v2 = vmul.f32 %v666_v0, %v552_v57  ;;  %v285_v3 = vmul.f32 %v666_v0, %v555_v58  ;;  %v286_v4 = vmul.f32 %v666_v0, %v556_v59 }
  0x2c   : > { %372 = vst [vmem:[%s693_s24 + $0xa0] sm:$0xff] %v340_v48  ;;  %v312_v6 = vadd.f32 %v674_v5, %v279_v60  ;;  %v313_v7 = vadd.f32 %v674_v5, %v280_v61  ;;  %v314_v8 = vadd.f32 %v674_v5, %v281_v62  ;;  %v315_v9 = vadd.f32 %v674_v5, %v282_v63 }
  0x2d   : > { %373 = vst [vmem:[%s693_s24 + $0xa8] sm:$0xff] %v341_v49  ;;  %v316_v10 = vadd.f32 %v674_v5, %v283_v1  ;;  %v317_v11 = vadd.f32 %v674_v5, %v284_v2  ;;  %v318_v14 = vadd.f32 %v674_v5, %v285_v3  ;;  %v319_v16 = vadd.f32 %v674_v5, %v286_v4 }
  0x2e   : > { %374 = vst [vmem:[%s693_s24 + $0xb0] sm:$0xff] %v342_v50  ;;  %v344_v0 = vmax.f32 %v312_v6, 0.0  ;;  %v345_v12 = vmax.f32 %v313_v7, 0.0  ;;  %v346_v13 = vmax.f32 %v314_v8, 0.0  ;;  %v347_v15 = vmax.f32 %v315_v9, 0.0 }
  0x2f   : > { %375 = vst [vmem:[%s693_s24 + $0xb8] sm:$0xff] %v343_v51  ;;  %v348_v17 = vmax.f32 %v316_v10, 0.0  ;;  %v349_v18 = vmax.f32 %v317_v11, 0.0  ;;  %v350_v19 = vmax.f32 %v318_v14, 0.0  ;;  %v351_v20 = vmax.f32 %v319_v16, 0.0 }
  0x30   : > { %376 = vst [vmem:[%s693_s24 + $0xc0] sm:$0xff] %v344_v0 }
  0x31   : > { %377 = vst [vmem:[%s693_s24 + $0xc8] sm:$0xff] %v345_v12 }
  0x32   : > { %378 = vst [vmem:[%s693_s24 + $0xd0] sm:$0xff] %v346_v13 }
  0x33   : > { %379 = vst [vmem:[%s693_s24 + $0xd8] sm:$0xff] %v347_v15 }
  0x34   : > { %380 = vst [vmem:[%s693_s24 + $0xe0] sm:$0xff] %v348_v17 }
  0x35   : > { %381 = vst [vmem:[%s693_s24 + $0xe8] sm:$0xff] %v349_v18 }
  0x36   : > { %382 = vst [vmem:[%s693_s24 + $0xf0] sm:$0xff] %v350_v19 }
  0x37   : > { %383 = vst [vmem:[%s693_s24 + $0xf8] sm:$0xff] %v351_v20 }
  0x38 PF: > { %s12_s11 = sadd.s32 1, %s620_s11   ;;  %s803_s9 = smov %s616_s10 }
  0x39   : > { %p9_p5 = scmp.ge.s32.totalorder %s12_s11, 4   ;;  %s804_s10 = smov %s806_s12 }
  0x3b   :  { %11 = sbr.rel (!%p9_p5) target bundleno = 2 (0x2), region = 58 }

// kernel: conv_block_forward.2
= control target key start
LH: loop header
LB: loop body
LE: loop exit
PB: predicated region body
PF: predicated region fallthrough
CT: control target
= control target key end

     0   :  { %s3396_s21 = smov 0   ;;  %s3398_s22 = smov 0   ;;  %s4518_s0 = inlined_call_operand.vmem [shape: bf16[2,18,18,4], index: 0, kind: input, shape index: {}, may-alias: {0,1,2}]   ;;  %s4519_s1 = inlined_call_operand.vmem [shape: bf16[2,18,18,4], index: 1, kind: input, shape index: {}, may-alias: {0,1,2}]   ;;  %s4520_s2 = inlined_call_operand.vmem [shape: bf16[2,18,18,4], index: 2, kind: input, shape index: {}, may-alias: {0,1,2}]   ;;  %s4521_s3 = inlined_call_operand.vmem [shape: bf16[9,4,128], index: 3, kind: input, shape index: {}]   ;;  %s4522_s4 = inlined_call_operand.vmem [shape: bf16[2,16,16,128], index: 4, kind: output, shape index: {0}]   ;;  %s4523_s5 = inlined_call_operand.vmem [shape: f32[16,128], index: 5, kind: output, shape index: {1}]   ;;  %s4524_s6 = inlined_call_operand.vmem [shape: f32[16,128], index: 6, kind: output, shape index: {2}]  }
   0x1   :  { %s3400_s23 = smov 0  }
   0x2 LB: > { %s36_s24 = sadd.s32 1, %s3355_s22  ;;  %p2928_p0 = scmp.ge.s32.totalorder %s3359_s23, 1  ;;  %s3359_s23 = sphi %s3400_s23, %s17_s23   ;;  %s3355_s22 = sphi %s3398_s22, %s4664_s22   ;;  %s3351_s21 = sphi %s3396_s21, %s4663_s21  }
   0x3   : > { %p38_p1 = scmp.ge.s32.totalorder %s36_s24, 2  ;;  %p322_p2 = scmp.lt.s32.totalorder %s3359_s23, 3 }
   0x5   : > { %s4666_s24 = smov (%p38_p1, %s36_s24), 0  ;;  %p323_p3 = pnand %p2928_p0, %p322_p2 }
   0x7   : > { %326 = sbr.rel (%p323_p3) target bundleno = 759 (0x2f7), region = 36 }
   0xc   : > { %v2936_v0 = vld [vmem:[%s4521_s3 + $0x2] sm:$0x3]  ;;  %vm1028_vm0 = vcmask 1041408   ;;  %p409_p4 = scmp.lt.s32.totalorder %s3351_s21, 1  ;;  %v3049_v2 = vld [vmem:[%s4521_s3 + $0x4] sm:$0x3] }
   0xd   : > { %v1030_v1 = vsel %vm1028_vm0, %v2936_v0, 0  ;;  %v1571_v3 = vsel %vm1028_vm0, %v3049_v2, 0  ;;  %v3066_v4 = vld [vmem:[%s4521_s3 + $0x6] sm:$0x3]  ;;  %v541_v5 = vld [vmem:[%s4521_s3] sm:$0x3] }
   0xe   : > { %3298 = vmatpush.bf16.msra.mxu1 %v1030_v1  ;;  %3299 = vmatpush.bf16.msra.mxu2 %v1030_v1  ;;  %s4668_s21 = smov (!%p409_p4, %s3351_s21), 1  ;;  %v3087_v6 = vld [vmem:[%s4521_s3 + $0x8] sm:$0x3]  ;;  %v1705_v7 = vsel %vm1028_vm0, %v3066_v4, 0  ;;  %v1250_v8 = vsel %vm1028_vm0, %v541_v5, 0  ;;  %vm979_vm4 = vcmask 31744  }
   0xf   : > { %3300 = vmatpush.bf16.msra.mxu3 %v1030_v1  ;;  %1039 = vmatpush.bf16.msra.mxu0 %v1030_v1  ;;  %s3434_s11 = smul.u32 216, %s4668_s21  ;;  %v1861_v9 = vsel %vm1028_vm0, %v3087_v6, 0  ;;  %vm542_vm1 = vsmask.f32 3328  ;;  %vm543_vm2 = vsmask.f32 7440 }
  0x10   : > { %vm3470_vm3 = vmor %vm542_vm1, %vm543_vm2  ;;  %vm1357_vm5 = vcmask 1042432   ;;  %vm1358_vm6 = vcmask 1046532   ;;  %s3184_s7 = sshll.u32 %s4668_s21, 7 }
  0x11   : > { %s3443_s14 = scalar_lea.vmem %s4518_s0, %s3434_s11  ;;  %vm3773_vm7 = vmor %vm1357_vm5, %vm1358_vm6  ;;  %s3181_s27 = sadd.s32 192, %s3434_s11 }
  0x12   : > { %1580 = vmatpush.bf16.msrb.mxu2 %v1571_v3  ;;  %1259 = vmatpush.bf16.msrb.mxu1 %v1250_v8  ;;  %v3446_v10 = vld [vmem:[%s3443_s14 + $0x30] sm:$0xf]  ;;  %v3449_v11 = vld [vmem:[%s3443_s14 + $0x34] sm:$0xf]  ;;  %v3452_v12 = vld [vmem:[%s3443_s14 + $0x38] sm:$0x1]  ;;  %s4168_s30 = scalar_lea.vmem %s4519_s1, %s3181_s27  ;;  %s4373_s10 = scalar_lea.vmem %s4522_s4, %s3184_s7 }
  0x13   : > { %1714 = vmatpush.bf16.msrb.mxu3 %v1705_v7  ;;  %1870 = vmatpush.bf16.msrb.mxu0 %v1861_v9  ;;  %v642_v13 = vshrl.u32 %v3446_v10, 16  ;;  %v645_v14 = vshll.u32 %v3446_v10, 16  ;;  %v651_v15 = vshll.u32 %v3449_v11, 16  ;;  %v655_v16 = vshrl.u32 %v3449_v11, 16  ;;  %v511_v17 = vld [vmem:[%s3443_s14 + $0x60] sm:$0xf] }
  0x14   : > { %v661_v18 = vshll.u32 %v3452_v12, 16  ;;  %v3461_v19 = vld [vmem:[%s3443_s14 + $0x64] sm:$0xf]  ;;  %v513_v20 = vld [vmem:[%s3443_s14 + $0x68] sm:$0x1]  ;;  %v738_v21 = vshrl.u32 %v511_v17, 16 }
  0x15   : > { %v644_v22 = vrot.slane %v642_v13, 4  ;;  %v647_v23 = vrot.slane %v645_v14, 5  ;;  %v653_v24 = vrot.slane %v651_v15, 5  ;;  %v657_v25 = vrot.slane %v655_v16, 4  ;;  %v523_v26 = vld [vmem:[%s3443_s14 + $0x90] sm:$0xf] }
  0x16   : > { %v663_v27 = vrot.slane %v661_v18, 5  ;;  %v740_v28 = vrot.slane %v738_v21, 4  ;;  %v741_v29 = vshll.u32 %v511_v17, 16  ;;  %v747_v30 = vshll.u32 %v3461_v19, 16  ;;  %v524_v35 = vld [vmem:[%s3443_s14 + $0x94] sm:$0xf] }
  0x17   : > { %v648_v31 = vor.u32 %v647_v23, %v644_v22  ;;  %v658_v32 = vor.u32 %v657_v25, %v653_v24  ;;  %v751_v33 = vshrl.u32 %v3461_v19, 16  ;;  %v757_v34 = vshll.u32 %v513_v20, 16  ;;  %v525_v45 = vld [vmem:[%s3443_s14 + $0x98] sm:$0x1]  ;;  %v3480_v61 = vld [vmem:[%s3443_s14] sm:$0xf] }
  0x18   : > { %v743_v37 = vrot.slane %v741_v29, 5  ;;  %v749_v38 = vrot.slane %v747_v30, 5  ;;  %v834_v39 = vshrl.u32 %v523_v26, 16  ;;  %v837_v47 = vshll.u32 %v523_v26, 16  ;;  %v3487_v1 = vld [vmem:[%s3443_s14 + $0x4] sm:$0xf] }
  0x19   : > { %v649_v40 = vrot.slane %v648_v31, 4  ;;  %v659_v41 = vrot.slane %v658_v32, 4  ;;  %v753_v42 = vrot.slane %v751_v33, 4  ;;  %v759_v43 = vrot.slane %v757_v34, 5  ;;  %v3490_v2 = vld [vmem:[%s3443_s14 + $0x8] sm:$0x1] }
  0x1a   : > { %v744_v44 = vor.u32 %v743_v37, %v740_v28  ;;  %v836_v46 = vrot.slane %v834_v39, 4  ;;  %v843_v48 = vshll.u32 %v524_v35, 16  ;;  %v847_v52 = vshrl.u32 %v524_v35, 16  ;;  %v3506_v23 = vld [vmem:[%s3443_s14 + $0x3c] sm:$0xf]  ;;  %s3183_s12 = sadd.s32 204, %s3434_s11 }
  0x1b   : > { %v654_v49 = vsel %vm3470_vm3, %v649_v40, %v653_v24  ;;  %v664_v50 = vsel %vm3470_vm3, %v659_v41, %v663_v27  ;;  %v754_v51 = vor.u32 %v753_v42, %v749_v38  ;;  %v839_v56 = vrot.slane %v837_v47, 5  ;;  %v3509_v24 = vld [vmem:[%s3443_s14 + $0x40] sm:$0xf]  ;;  %v3514_v29 = vld [vmem:[%s3443_s14 + $0x44] sm:$0x1]  ;;  %s4422_s15 = scalar_lea.vmem %s4520_s2, %s3183_s12  ;;  %s2934_s11 = sshll.u32 %s4668_s21, 3 }
  0x1c   : > { %v939_v53 = vunpack.c.l.b16 %v654_v49  ;;  %v940_v54 = vunpack.c.l.b16 %v664_v50  ;;  %v745_v55 = vrot.slane %v744_v44, 4  ;;  %v845_v58 = vrot.slane %v843_v48, 5  ;;  %v3529_v47 = vld [vmem:[%s3443_s14 + $0x70] sm:$0xf]  ;;  %s473_s18 = scalar_lea.vmem %s4523_s5, %s2934_s11  ;;  %s477_s25 = scalar_lea.vmem %s4524_s6, %s2934_s11 }
  0x1d   : > { %v755_v57 = vrot.slane %v754_v51, 4  ;;  %v849_v59 = vrot.slane %v847_v52, 4  ;;  %v853_v60 = vshll.u32 %v525_v45, 16  ;;  %v840_v0 = vor.u32 %v839_v56, %v836_v46  ;;  %v3536_v51 = vld [vmem:[%s3443_s14 + $0x74] sm:$0x1] }
  0x1e   : > { %v3482_v62 = vpack.c.b16 %v940_v54, %v939_v53  ;;  %v750_v63 = vsel %vm3470_vm3, %v745_v55, %v749_v38  ;;  %v546_v9 = vshrl.u32 %v3480_v61, 16  ;;  %v549_v13 = vshll.u32 %v3480_v61, 16  ;;  %v3522_v38 = vld [vmem:[%s3443_s14 + $0x6c] sm:$0xf] }
  0x1f   : > { %v760_v3 = vsel %vm3470_vm3, %v755_v57, %v759_v43  ;;  %v947_v4 = vunpack.c.l.b16 %v750_v63  ;;  %v850_v5 = vor.u32 %v849_v59, %v845_v58  ;;  %v855_v6 = vrot.slane %v853_v60, 5 }
  0x20   : > { %2941 = vmatmul.msk.bf16.vlgmr.msra.gmra.mxu1 %vm979_vm4, %v3482_v62  ;;  %v948_v7 = vunpack.c.l.b16 %v760_v3  ;;  %v841_v8 = vrot.slane %v840_v0, 4  ;;  %v555_v15 = vshll.u32 %v3487_v1, 16  ;;  %v559_v16 = vshrl.u32 %v3487_v1, 16 }
  0x21   : > { %v851_v14 = vrot.slane %v850_v5, 4  ;;  %v565_v17 = vshll.u32 %v3490_v2, 16  ;;  %v548_v21 = vrot.slane %v546_v9, 4  ;;  %v551_v22 = vrot.slane %v549_v13, 5  ;;  %v526_v5 = vld [vmem:[%s3443_s14 + $0x9c] sm:$0xf] }
  0x22   : > { %v3501_v18 = vpack.c.b16 %v948_v7, %v947_v4  ;;  %v846_v20 = vsel %vm3470_vm3, %v841_v8, %v845_v58  ;;  %v557_v27 = vrot.slane %v555_v15, 5  ;;  %v561_v28 = vrot.slane %v559_v16, 4  ;;  %v527_v9 = vld [vmem:[%s3443_s14 + $0xa0] sm:$0xf] }
  0x23   : > { %v856_v25 = vsel %vm3470_vm3, %v851_v14, %v855_v6  ;;  %v955_v26 = vunpack.c.l.b16 %v846_v20  ;;  %v552_v31 = vor.u32 %v551_v22, %v548_v21  ;;  %v567_v32 = vrot.slane %v565_v17, 5  ;;  %v528_v17 = vld [vmem:[%s3443_s14 + $0xa4] sm:$0x1] }
  0x24   : > { %4567 = vst [vmem:[#allocation2_spill] sm:$0xff] %v3501_v18  ;;  %2945 = vmatmul.msk.bf16.vlgmr.msra.gmra.mxu2 %vm979_vm4, %v3501_v18  ;;  %v956_v30 = vunpack.c.l.b16 %v856_v25  ;;  %v562_v33 = vor.u32 %v561_v28, %v557_v27  ;;  %v666_v34 = vshrl.u32 %v3506_v23, 16  ;;  %v669_v35 = vshll.u32 %v3506_v23, 16 }
  0x25   : > { %v675_v37 = vshll.u32 %v3509_v24, 16  ;;  %v553_v40 = vrot.slane %v552_v31, 4  ;;  %v679_v41 = vshrl.u32 %v3509_v24, 16  ;;  %v685_v42 = vshll.u32 %v3514_v29, 16 }
  0x26   : > { %v3524_v39 = vpack.c.b16 %v956_v30, %v955_v26  ;;  %v563_v43 = vrot.slane %v562_v33, 4  ;;  %v668_v44 = vrot.slane %v666_v34, 4  ;;  %v671_v45 = vrot.slane %v669_v35, 5  ;;  %v3554_v35 = vld [vmem:[%s3443_s14 + $0xc] sm:$0xf] }
  0x27   : > { %v677_v46 = vrot.slane %v675_v37, 5  ;;  %v558_v48 = vsel %vm3470_vm3, %v553_v40, %v557_v27  ;;  %v681_v49 = vrot.slane %v679_v41, 4  ;;  %v687_v50 = vrot.slane %v685_v42, 5 }
  0x28   : > { %4568 = vst [vmem:[#allocation3_spill] sm:$0xff] %v3524_v39  ;;  %2949 = vmatmul.msk.bf16.vlgmr.msra.gmra.mxu3 %vm979_vm4, %v3524_v39  ;;  %v762_v52 = vshrl.u32 %v3522_v38, 16  ;;  %v568_v53 = vsel %vm3470_vm3, %v563_v43, %v567_v32  ;;  %v931_v54 = vunpack.c.l.b16 %v558_v48  ;;  %v672_v55 = vor.u32 %v671_v45, %v668_v44  ;;  %v3561_v43 = vld [vmem:[%s3443_s14 + $0x10] sm:$0xf]  ;;  %v3564_v48 = vld [vmem:[%s3443_s14 + $0x14] sm:$0x1] }
  0x29   : > { %v765_v56 = vshll.u32 %v3522_v38, 16  ;;  %v932_v57 = vunpack.c.l.b16 %v568_v53  ;;  %v682_v58 = vor.u32 %v681_v49, %v677_v46  ;;  %v771_v60 = vshll.u32 %v3529_v47, 16  ;;  %v3741_v39 = vld [vmem:[%s3443_s14 + $0x2c] sm:$0x1] }
  0x2a   : > { %v764_v59 = vrot.slane %v762_v52, 4  ;;  %v673_v63 = vrot.slane %v672_v55, 4  ;;  %v775_v3 = vshrl.u32 %v3529_v47, 16  ;;  %v781_v4 = vshll.u32 %v3536_v51, 16 }
  0x2b   : > { %v767_v0 = vrot.slane %v765_v56, 5  ;;  %v963_v6 = vpack.c.b16 %v932_v57, %v931_v54  ;;  %v683_v7 = vrot.slane %v682_v58, 4  ;;  %v773_v8 = vrot.slane %v771_v60, 5  ;;  %v3574_v58 = vld [vmem:[%s3443_s14 + $0x48] sm:$0xf] }
  0x2c   : > { %v678_v13 = vsel %vm3470_vm3, %v673_v63, %v677_v46  ;;  %v777_v15 = vrot.slane %v775_v3, 4  ;;  %v783_v16 = vrot.slane %v781_v4, 5  ;;  %v858_v22 = vshrl.u32 %v526_v5, 16  ;;  %v3579_v3 = vld [vmem:[%s3443_s14 + $0x4c] sm:$0xf] }
  0x2d   : > { %v768_v14 = vor.u32 %v767_v0, %v764_v59  ;;  %2937 = vmatmul.msk.bf16.vlgmr.msra.gmra.mxu0 %vm979_vm4, %v963_v6  ;;  %v688_v20 = vsel %vm3470_vm3, %v683_v7, %v687_v50  ;;  %v941_v21 = vunpack.c.l.b16 %v678_v13  ;;  %v861_v25 = vshll.u32 %v526_v5, 16 }
  0x2e   : > { %v942_v26 = vunpack.c.l.b16 %v688_v20  ;;  %v778_v28 = vor.u32 %v777_v15, %v773_v8  ;;  %v867_v30 = vshll.u32 %v527_v9, 16  ;;  %v860_v31 = vrot.slane %v858_v22, 4  ;;  %v3586_v15 = vld [vmem:[%s3443_s14 + $0x50] sm:$0x1] }
  0x2f   : > { %v769_v27 = vrot.slane %v768_v14, 4  ;;  %v863_v32 = vrot.slane %v861_v25, 5  ;;  %v871_v33 = vshrl.u32 %v527_v9, 16  ;;  %v877_v34 = vshll.u32 %v528_v17, 16 }
  0x30   : > { %v3556_v37 = vpack.c.b16 %v942_v26, %v941_v21  ;;  %v779_v41 = vrot.slane %v778_v28, 4  ;;  %v869_v42 = vrot.slane %v867_v30, 5  ;;  %v570_v52 = vshrl.u32 %v3554_v35, 16  ;;  %v3597_v28 = vld [vmem:[%s3443_s14 + $0x78] sm:$0xf] }
  0x31   : > { %v774_v40 = vsel %vm3470_vm3, %v769_v27, %v773_v8  ;;  %v864_v45 = vor.u32 %v863_v32, %v860_v31  ;;  %v873_v46 = vrot.slane %v871_v33, 4  ;;  %v879_v50 = vrot.slane %v877_v34, 5  ;;  %v3601_v34 = vld [vmem:[%s3443_s14 + $0x7c] sm:$0xf] }
  0x32   : > { %v949_v44 = vunpack.c.l.b16 %v774_v40  ;;  %2942 = vmatmul.msk.bf16.gmra.mxu1 %vm979_vm4, %v3556_v37  ;;  %v784_v49 = vsel %vm3470_vm3, %v779_v41, %v783_v16  ;;  %v573_v53 = vshll.u32 %v3554_v35, 16  ;;  %v579_v57 = vshll.u32 %v3561_v43, 16 }
  0x33   : > { %v950_v54 = vunpack.c.l.b16 %v784_v49  ;;  %v865_v55 = vrot.slane %v864_v45, 4  ;;  %v874_v56 = vor.u32 %v873_v46, %v869_v42  ;;  %v572_v59 = vrot.slane %v570_v52, 4 }
  0x34   : > { %v575_v60 = vrot.slane %v573_v53, 5  ;;  %v583_v63 = vshrl.u32 %v3561_v43, 16  ;;  %v589_v0 = vshll.u32 %v3564_v48, 16  ;;  %v581_v7 = vrot.slane %v579_v57, 5 }
  0x35   : > { %v3581_v4 = vpack.c.b16 %v950_v54, %v949_v44  ;;  %v870_v5 = vsel %vm3470_vm3, %v865_v55, %v869_v42  ;;  %v875_v6 = vrot.slane %v874_v56, 4  ;;  %v690_v17 = vshrl.u32 %v3574_v58, 16 }
  0x36   : > { %v957_v8 = vunpack.c.l.b16 %v870_v5  ;;  %v576_v9 = vor.u32 %v575_v60, %v572_v59  ;;  %v585_v13 = vrot.slane %v583_v63, 4  ;;  %v591_v14 = vrot.slane %v589_v0, 5 }
  0x37   : > { %2946 = vmatmul.msk.bf16.gmra.mxu2 %vm979_vm4, %v3581_v4  ;;  %v880_v16 = vsel %vm3470_vm3, %v875_v6, %v879_v50  ;;  %v693_v20 = vshll.u32 %v3574_v58, 16  ;;  %v699_v21 = vshll.u32 %v3579_v3, 16  ;;  %v703_v27 = vshrl.u32 %v3579_v3, 16  ;;  %v3608_v50 = vld [vmem:[%s3443_s14 + $0x80] sm:$0x1] }
  0x38   : > { %v958_v22 = vunpack.c.l.b16 %v880_v16  ;;  %v577_v25 = vrot.slane %v576_v9, 4  ;;  %v586_v26 = vor.u32 %v585_v13, %v581_v7  ;;  %v692_v30 = vrot.slane %v690_v17, 4  ;;  %v3627_v16 = vld [vmem:[%s3443_s14 + $0xac] sm:$0xf]  ;;  %v3630_v17 = vld [vmem:[%s3443_s14 + $0xb0] sm:$0x1] }
  0x39   : > { %v695_v31 = vrot.slane %v693_v20, 5  ;;  %v701_v32 = vrot.slane %v699_v21, 5  ;;  %v709_v33 = vshll.u32 %v3586_v15, 16  ;;  %v705_v44 = vrot.slane %v703_v27, 4  ;;  %4571 = vst [vmem:[#allocation6_spill] sm:$0xff] %v3627_v16 }
  0x3a   : > { %v3603_v40 = vpack.c.b16 %v958_v22, %v957_v8  ;;  %v582_v41 = vsel %vm3470_vm3, %v577_v25, %v581_v7  ;;  %v587_v42 = vrot.slane %v586_v26, 4  ;;  %v786_v52 = vshrl.u32 %v3597_v28, 16  ;;  %v3620_v8 = vld [vmem:[%s3443_s14 + $0xa8] sm:$0xf]  ;;  %4572 = vst [vmem:[#allocation7_spill] sm:$0xff] %v3630_v17 }
  0x3b   : > { %v933_v45 = vunpack.c.l.b16 %v582_v41  ;;  %v696_v46 = vor.u32 %v695_v31, %v692_v30  ;;  %v711_v49 = vrot.slane %v709_v33, 5  ;;  %v706_v54 = vor.u32 %v705_v44, %v701_v32  ;;  %4570 = vst [vmem:[#allocation5_spill] sm:$0xff] %v3620_v8 }
  0x3c   : > { %4569 = vst [vmem:[#allocation4_spill] sm:$0xff] %v3603_v40  ;;  %2950 = vmatmul.msk.bf16.gmra.mxu3 %vm979_vm4, %v3603_v40  ;;  %v592_v53 = vsel %vm3470_vm3, %v587_v42, %v591_v14  ;;  %v789_v55 = vshll.u32 %v3597_v28, 16  ;;  %v795_v56 = vshll.u32 %v3601_v34, 16  ;;  %v788_v60 = vrot.slane %v786_v52, 4  ;;  %v3644_v52 = vld [vmem:[%s3443_s14 + $0x18] sm:$0xf] }
  0x3d   : > { %v934_v57 = vunpack.c.l.b16 %v592_v53  ;;  %v697_v59 = vrot.slane %v696_v46, 4  ;;  %v799_v63 = vshrl.u32 %v3601_v34, 16  ;;  %v707_v0 = vrot.slane %v706_v54, 4  ;;  %v3730_v40 = vld [vmem:[%s3443_s14 + $0x24] sm:$0xf] }
  0x3e   : > { %v791_v5 = vrot.slane %v789_v55, 5  ;;  %v797_v6 = vrot.slane %v795_v56, 5  ;;  %v805_v7 = vshll.u32 %v3608_v50, 16  ;;  %v882_v30 = vshrl.u32 %v3620_v8, 16  ;;  %v3649_v56 = vld [vmem:[%s3443_s14 + $0x1c] sm:$0xf] }
  0x3f   : > { %v3622_v9 = vpack.c.b16 %v934_v57, %v933_v45  ;;  %v702_v13 = vsel %vm3470_vm3, %v697_v59, %v701_v32  ;;  %v801_v14 = vrot.slane %v799_v63, 4  ;;  %v712_v20 = vsel %vm3470_vm3, %v707_v0, %v711_v49  ;;  %v3652_v57 = vld [vmem:[%s3443_s14 + $0x20] sm:$0x1] }
  0x40   : > { %v943_v21 = vunpack.c.l.b16 %v702_v13  ;;  %v792_v22 = vor.u32 %v791_v5, %v788_v60  ;;  %v807_v25 = vrot.slane %v805_v7, 5  ;;  %v944_v26 = vunpack.c.l.b16 %v712_v20 }
  0x41   : > { %2938 = vmatmul.msk.bf16.gmra.mxu0 %vm979_vm4, %v3622_v9  ;;  %v802_v27 = vor.u32 %v801_v14, %v797_v6  ;;  %v885_v31 = vshll.u32 %v3620_v8, 16  ;;  %v891_v33 = vshll.u32 %v3627_v16, 16  ;;  %v895_v41 = vshrl.u32 %v3627_v16, 16 }
  0x42   : > { %v793_v32 = vrot.slane %v792_v22, 4  ;;  %v901_v42 = vshll.u32 %v3630_v17, 16  ;;  %v3641_v44 = vpack.c.b16 %v944_v26, %v943_v21  ;;  %v884_v46 = vrot.slane %v882_v30, 4  ;;  %v3664_v26 = vld [vmem:[%s3443_s14 + $0x54] sm:$0xf] }
  0x43   : > { %v803_v45 = vrot.slane %v802_v27, 4  ;;  %v887_v49 = vrot.slane %v885_v31, 5  ;;  %v893_v54 = vrot.slane %v891_v33, 5  ;;  %v897_v55 = vrot.slane %v895_v41, 4  ;;  %v3708_v17 = vld [vmem:[%s3443_s14 + $0xb4] sm:$0xf] }
  0x44   : > { %4573 = vst [vmem:[#allocation8_spill] sm:$0xff] %v3641_v44  ;;  %v798_v53 = vsel %vm3470_vm3, %v793_v32, %v797_v6  ;;  %2943 = vmatmul.msk.bf16.gmra.mxu1 %vm979_vm4, %v3641_v44  ;;  %v903_v0 = vrot.slane %v901_v42, 5  ;;  %v594_v6 = vshrl.u32 %v3644_v52, 16  ;;  %v597_v13 = vshll.u32 %v3644_v52, 16  ;;  %v3669_v32 = vld [vmem:[%s3443_s14 + $0x58] sm:$0xf] }
  0x45   : > { %v808_v59 = vsel %vm3470_vm3, %v803_v45, %v807_v25  ;;  %v951_v60 = vunpack.c.l.b16 %v798_v53  ;;  %v888_v63 = vor.u32 %v887_v49, %v884_v46  ;;  %v898_v7 = vor.u32 %v897_v55, %v893_v54  ;;  %v3674_v46 = vld [vmem:[%s3443_s14 + $0x5c] sm:$0x1]  ;;  %4576 = vst [vmem:[#allocation11_spill] sm:$0xff] %v3708_v17 }
  0x46   : > { %v952_v5 = vunpack.c.l.b16 %v808_v59  ;;  %v603_v20 = vshll.u32 %v3649_v56, 16  ;;  %v607_v21 = vshrl.u32 %v3649_v56, 16  ;;  %v613_v22 = vshll.u32 %v3652_v57, 16 }
  0x47   : > { %v889_v14 = vrot.slane %v888_v63, 4  ;;  %v899_v27 = vrot.slane %v898_v7, 4  ;;  %v596_v30 = vrot.slane %v594_v6, 4  ;;  %v599_v31 = vrot.slane %v597_v13, 5  ;;  %v3684_v7 = vld [vmem:[%s3443_s14 + $0x84] sm:$0xf] }
  0x48   : > { %v3666_v25 = vpack.c.b16 %v952_v5, %v951_v60  ;;  %v605_v41 = vrot.slane %v603_v20, 5  ;;  %v609_v42 = vrot.slane %v607_v21, 4  ;;  %v615_v45 = vrot.slane %v613_v22, 5  ;;  %4574 = vst [vmem:[#allocation9_spill] sm:$0xff] %v3684_v7 }
  0x49   : > { %v894_v33 = vsel %vm3470_vm3, %v889_v14, %v893_v54  ;;  %v904_v49 = vsel %vm3470_vm3, %v899_v27, %v903_v0  ;;  %v600_v55 = vor.u32 %v599_v31, %v596_v30  ;;  %v714_v59 = vshrl.u32 %v3664_v26, 16  ;;  %v3691_v30 = vld [vmem:[%s3443_s14 + $0x88] sm:$0xf] }
  0x4a   : > { %2947 = vmatmul.msk.bf16.gmra.mxu2 %vm979_vm4, %v3666_v25  ;;  %v959_v53 = vunpack.c.l.b16 %v894_v33  ;;  %v960_v60 = vunpack.c.l.b16 %v904_v49  ;;  %v610_v63 = vor.u32 %v609_v42, %v605_v41  ;;  %v717_v54 = vshll.u32 %v3664_v26, 16  ;;  %v3696_v49 = vld [vmem:[%s3443_s14 + $0x8c] sm:$0x1] }
  0x4b   : > { %v723_v5 = vshll.u32 %v3669_v32, 16  ;;  %v601_v6 = vrot.slane %v600_v55, 4  ;;  %v716_v13 = vrot.slane %v714_v59, 4  ;;  %v727_v14 = vshrl.u32 %v3669_v32, 16 }
  0x4c   : > { %v733_v0 = vshll.u32 %v3674_v46, 16  ;;  %v3688_v20 = vpack.c.b16 %v960_v60, %v959_v53  ;;  %v611_v21 = vrot.slane %v610_v63, 4  ;;  %v719_v22 = vrot.slane %v717_v54, 5 }
  0x4d   : > { %v725_v27 = vrot.slane %v723_v5, 5  ;;  %v606_v31 = vsel %vm3470_vm3, %v601_v6, %v605_v41  ;;  %v729_v33 = vrot.slane %v727_v14, 4  ;;  %v810_v55 = vshrl.u32 %v3684_v7, 16 }
  0x4e   : > { %4575 = vst [vmem:[#allocation10_spill] sm:$0xff] %v3688_v20  ;;  %v735_v42 = vrot.slane %v733_v0, 5  ;;  %2951 = vmatmul.msk.bf16.gmra.mxu3 %vm979_vm4, %v3688_v20  ;;  %v616_v53 = vsel %vm3470_vm3, %v611_v21, %v615_v45  ;;  %v935_v59 = vunpack.c.l.b16 %v606_v31  ;;  %v720_v60 = vor.u32 %v719_v22, %v716_v13  ;;  %v3713_v22 = vld [vmem:[%s3443_s14 + $0xb8] sm:$0xf] }
  0x4f   : > { %v813_v63 = vshll.u32 %v3684_v7, 16  ;;  %v936_v54 = vunpack.c.l.b16 %v616_v53  ;;  %v730_v41 = vor.u32 %v729_v33, %v725_v27  ;;  %v812_v5 = vrot.slane %v810_v55, 4  ;;  %4577 = vst [vmem:[#allocation12_spill] sm:$0xff] %v3713_v22 }
  0x50   : > { %v819_v6 = vshll.u32 %v3691_v30, 16  ;;  %v721_v14 = vrot.slane %v720_v60, 4  ;;  %v823_v8 = vshrl.u32 %v3691_v30, 16  ;;  %v829_v20 = vshll.u32 %v3696_v49, 16  ;;  %v3718_v60 = vld [vmem:[%s3443_s14 + $0xbc] sm:$0x1] }
  0x51   : > { %v815_v0 = vrot.slane %v813_v63, 5  ;;  %v3710_v45 = vpack.c.b16 %v936_v54, %v935_v59  ;;  %v731_v21 = vrot.slane %v730_v41, 4  ;;  %4578 = vst [vmem:[#allocation13_spill] sm:$0xff] %v3718_v60  ;;  %v906_v54 = vshrl.u32 %v3708_v17, 16 }
  0x52   : > { %v821_v13 = vrot.slane %v819_v6, 5  ;;  %v726_v31 = vsel %vm3470_vm3, %v721_v14, %v725_v27  ;;  %v825_v55 = vrot.slane %v823_v8, 4  ;;  %v831_v53 = vrot.slane %v829_v20, 5 }
  0x53   : > { %v816_v33 = vor.u32 %v815_v0, %v812_v5  ;;  %2939 = vmatmul.msk.bf16.gmra.mxu0 %vm979_vm4, %v3710_v45  ;;  %v736_v59 = vsel %vm3470_vm3, %v731_v21, %v735_v42  ;;  %v945_v63 = vunpack.c.l.b16 %v726_v31  ;;  %v909_v41 = vshll.u32 %v3708_v17, 16 }
  0x54   : > { %v946_v6 = vunpack.c.l.b16 %v736_v59  ;;  %v826_v5 = vor.u32 %v825_v55, %v821_v13  ;;  %v915_v8 = vshll.u32 %v3713_v22, 16  ;;  %v908_v20 = vrot.slane %v906_v54, 4 }
  0x55   : > { %v817_v27 = vrot.slane %v816_v33, 4  ;;  %v911_v14 = vrot.slane %v909_v41, 5  ;;  %v919_v0 = vshrl.u32 %v3713_v22, 16  ;;  %v925_v16 = vshll.u32 %v3718_v60, 16  ;;  %v3737_v33 = vld [vmem:[%s3443_s14 + $0x28] sm:$0xf] }
  0x56   : > { %v3732_v42 = vpack.c.b16 %v946_v6, %v945_v63  ;;  %v827_v31 = vrot.slane %v826_v5, 4  ;;  %v917_v59 = vrot.slane %v915_v8, 5  ;;  %v1365_v55 = vrot.slane %v3490_v2, 5 }
  0x57   : > { %v822_v21 = vsel %vm3470_vm3, %v817_v27, %v821_v13  ;;  %v912_v54 = vor.u32 %v911_v14, %v908_v20  ;;  %v921_v41 = vrot.slane %v919_v0, 4  ;;  %v927_v6 = vrot.slane %v925_v16, 5 }
  0x58   : > { %4579 = vst [vmem:[#allocation14_spill] sm:$0xff] %v3732_v42  ;;  %v953_v17 = vunpack.c.l.b16 %v822_v21  ;;  %2944 = vmatmul.msk.bf16.gmra.mxu1 %vm979_vm4, %v3732_v42  ;;  %v832_v63 = vsel %vm3470_vm3, %v827_v31, %v831_v53  ;;  %v618_v13 = vshrl.u32 %v3730_v40, 16  ;;  %v621_v27 = vshll.u32 %v3730_v40, 16 }
  0x59   : > { %v954_v5 = vunpack.c.l.b16 %v832_v63  ;;  %v913_v8 = vrot.slane %v912_v54, 4  ;;  %v922_v60 = vor.u32 %v921_v41, %v917_v59  ;;  %v627_v2 = vshll.u32 %v3737_v33, 16  ;;  %v3122_v54 = vld [vmem:[%s4521_s3 + $0xc] sm:$0x3]  ;;  %v3143_v41 = vld [vmem:[%s4521_s3 + $0xe] sm:$0x3] }
  0x5a   : > { %v620_v20 = vrot.slane %v618_v13, 4  ;;  %v623_v14 = vrot.slane %v621_v27, 5  ;;  %v631_v0 = vshrl.u32 %v3737_v33, 16  ;;  %v637_v21 = vshll.u32 %v3741_v39, 16 }
  0x5b   : > { %v3752_v22 = vpack.c.b16 %v954_v5, %v953_v17  ;;  %v918_v16 = vsel %vm3470_vm3, %v913_v8, %v917_v59  ;;  %v923_v53 = vrot.slane %v922_v60, 4  ;;  %v629_v31 = vrot.slane %v627_v2, 5  ;;  %v3105_v17 = vld [vmem:[%s4521_s3 + $0xa] sm:$0x3]  ;;  %v3161_v60 = vld [vmem:[%s4521_s3 + $0x10] sm:$0x3] }
  0x5c   : > { %v961_v63 = vunpack.c.l.b16 %v918_v16  ;;  %v624_v13 = vor.u32 %v623_v14, %v620_v20  ;;  %v633_v27 = vrot.slane %v631_v0, 4  ;;  %v639_v7 = vrot.slane %v637_v21, 5 }
  0x5d   : > { %4580 = vst [vmem:[#allocation15_spill] sm:$0xff] %v3752_v22  ;;  %2948 = vmatmul.msk.bf16.gmra.mxu2 %vm979_vm4, %v3752_v22  ;;  %v928_v59 = vsel %vm3470_vm3, %v923_v53, %v927_v6  ;;  %v3033_v5 = vrot.slane %v3480_v61, 9  ;;  %v1362_v0 = vrot.slane %v3487_v1, 5  ;;  %v2135_v21 = vsel %vm1028_vm0, %v3122_v54, 0 }
  0x5e   : > { %v962_v8 = vunpack.c.l.b16 %v928_v59  ;;  %v625_v2 = vrot.slane %v624_v13, 4  ;;  %v634_v20 = vor.u32 %v633_v27, %v629_v31  ;;  %v2291_v16 = vsel %vm1028_vm0, %v3143_v41, 0  ;;  %2144 = vmatpush.bf16.msra.mxu2 %v2135_v21  ;;  %v3186_v21 = vld [vmem:[%s3443_s14 + $0xc] sm:$0xff] }
  0x5f   : > { %v2001_v22 = vsel %vm1028_vm0, %v3105_v17, 0  ;;  %v2431_v6 = vsel %vm1028_vm0, %v3161_v60, 0  ;;  %v1363_v27 = vsel %vm3773_vm7, %v3033_v5, %v1362_v0  ;;  %2300 = vmatpush.bf16.msra.mxu3 %v2291_v16  ;;  %v1364_v54 = vrot.slane %v1362_v0, 4 }
  0x60   : > { %v3782_v53 = vpack.c.b16 %v962_v8, %v961_v63  ;;  %v630_v61 = vsel %vm3470_vm3, %v625_v2, %v629_v31  ;;  %v635_v13 = vrot.slane %v634_v20, 4  ;;  %2010 = vmatpush.bf16.msra.mxu1 %v2001_v22  ;;  %2440 = vmatpush.bf16.msra.mxu0 %v2431_v6  ;;  %v3034_v41 = vrot.slane %v3554_v35, 9  ;;  %v3185_v22 = vld [vmem:[%s3443_s14] sm:$0xff]  ;;  %v3819_v6 = vld [vmem:[%s3443_s14 + $0x18] sm:$0xff] }
  0x61   : > { %v937_v1 = vunpack.c.l.b16 %v630_v61  ;;  %v1474_v31 = vunpack.c.l.b16 %v1363_v27  ;;  %v1369_v17 = vrot.slane %v3561_v43, 5  ;;  %v1372_v60 = vrot.slane %v3564_v48, 5 }
  0x62   : > { %2952 = vmatmul.msk.bf16.gmra.mxu3 %vm979_vm4, %v3782_v53  ;;  %v640_v63 = vsel %vm3470_vm3, %v635_v13, %v639_v7  ;;  %v1366_v5 = vsel %vm3773_vm7, %v1364_v54, %v1365_v55  ;;  %v1376_v16 = vrot.slane %v3649_v56, 5  ;;  %v3035_v61 = vrot.slane %v3644_v52, 9 }
  0x63   : > { %v938_v59 = vunpack.c.l.b16 %v640_v63  ;;  %v1475_v8 = vunpack.c.l.b16 %v1366_v5  ;;  %v1370_v35 = vsel %vm3773_vm7, %v3034_v41, %v1369_v17  ;;  %v1371_v2 = vrot.slane %v1369_v17, 4  ;;  %v3839_v41 = vld [vmem:[%s3443_s14 + $0x24] sm:$0xff] }
  0x64   : > { %v1476_v7 = vunpack.c.l.b16 %v1370_v35  ;;  %v1378_v13 = vrot.slane %v1376_v16, 4  ;;  %v1379_v27 = vrot.slane %v3652_v57, 5  ;;  %v1383_v57 = vrot.slane %v3737_v33, 5 }
  0x65   : > { %v3800_v20 = vpack.c.b16 %v938_v59, %v937_v1  ;;  %v1506_v0 = vpack.c.b16 %v1475_v8, %v1474_v31  ;;  %v1373_v43 = vsel %vm3773_vm7, %v1371_v2, %v1372_v60  ;;  %v3036_v63 = vrot.slane %v3730_v40, 9  ;;  %v3861_v8 = vld [vmem:[%s3443_s14 + $0x30] sm:$0xff] }
  0x66   : > { %v1477_v48 = vunpack.c.l.b16 %v1373_v43  ;;  %v1380_v56 = vsel %vm3773_vm7, %v1378_v13, %v1379_v27  ;;  %v1385_v31 = vrot.slane %v1383_v57, 4  ;;  %v1386_v17 = vrot.slane %v3741_v39, 5  ;;  %v3889_v27 = vld [vmem:[%s3443_s14 + $0x3c] sm:$0xff] }
  0x67   : > { %2940 = vmatmul.msk.bf16.gmra.mxu0 %vm979_vm4, %v3800_v20  ;;  %v1479_v54 = vunpack.c.l.b16 %v1380_v56  ;;  %v1384_v60 = vsel %vm3773_vm7, %v3036_v63, %v1383_v57  ;;  %v1390_v39 = vrot.slane %v3449_v11, 5  ;;  %v3037_v35 = vrot.slane %v3446_v10, 9 }
  0x68   : > { %3017 = vmatmul.msk.bf16.vlgmr.msrb.gmra.mxu1 %vm979_vm4, %v3185_v22  ;;  %v3807_v55 = vpack.c.b16 %v1477_v48, %v1476_v7  ;;  %v1387_v33 = vsel %vm3773_vm7, %v1385_v31, %v1386_v17  ;;  %v1480_v59 = vunpack.c.l.b16 %v1384_v60  ;;  %v1393_v7 = vrot.slane %v3452_v12, 5 }
  0x69   : > { %v1481_v5 = vunpack.c.l.b16 %v1387_v33  ;;  %v1392_v2 = vrot.slane %v1390_v39, 4  ;;  %v1397_v13 = vrot.slane %v3509_v24, 5  ;;  %v3038_v56 = vrot.slane %v3506_v23, 9 }
  0x6b   : > { %v3853_v40 = vpack.c.b16 %v1481_v5, %v1480_v59  ;;  %v1394_v11 = vsel %vm3773_vm7, %v1392_v2, %v1393_v7  ;;  %v1398_v24 = vsel %vm3773_vm7, %v3038_v56, %v1397_v13  ;;  %v1404_v5 = vrot.slane %v3579_v3, 5 }
  0x6c   : > { %v1484_v23 = vunpack.c.l.b16 %v1398_v24  ;;  %v3039_v7 = vrot.slane %v3574_v58, 9  ;;  %v1411_v24 = vrot.slane %v3669_v32, 5 }
  0x6d   : > { %3050 = vmatmul.msk.bf16.vlgmr.msrb.gmra.mxu2 %vm979_vm4, %v1506_v0  ;;  %v1391_v0 = vsel %vm3773_vm7, %v3037_v35, %v1390_v39  ;;  %v3923_v35 = vld [vmem:[%s3443_s14 + $0x48] sm:$0xff] }
  0x6e   : > { %v1482_v48 = vunpack.c.l.b16 %v1391_v0  ;;  %4585 = vst [vmem:[#allocation18_spill] sm:$0xff] %v3923_v35  ;;  %v1406_v0 = vrot.slane %v1404_v5, 4 }
  0x72   : > { %3071 = vmatmul.msk.bf16.vlgmr.msrb.gmra.mxu3 %vm979_vm4, %v3186_v21 }
  0x77   : > { %3088 = vmatmul.msk.bf16.vlgmr.msrb.gmra.mxu0 %vm979_vm4, %v3622_v9  ;;  %v1377_v9 = vsel %vm3773_vm7, %v3035_v61, %v1376_v16 }
  0x78   : > { %3018 = vmatmul.msk.bf16.gmra.mxu1 %vm979_vm4, %v3186_v21  ;;  %v1478_v1 = vunpack.c.l.b16 %v1377_v9  ;;  %v1483_v21 = vunpack.c.l.b16 %v1394_v11  ;;  %v1407_v11 = vrot.slane %v3586_v15, 5 }
  0x7a   : > { %v3833_v52 = vpack.c.b16 %v1479_v54, %v1478_v1  ;;  %v3881_v12 = vpack.c.b16 %v1483_v21, %v1482_v48  ;;  %v1399_v1 = vrot.slane %v1397_v13, 4  ;;  %v1400_v54 = vrot.slane %v3514_v29, 5 }
  0x7b   : > { %v1405_v21 = vsel %vm3773_vm7, %v3039_v7, %v1404_v5  ;;  %v1408_v13 = vsel %vm3773_vm7, %v1406_v0, %v1407_v11  ;;  %v3040_v5 = vrot.slane %v3664_v26, 9  ;;  %v1413_v7 = vrot.slane %v1411_v24, 4 }
  0x7c   : > { %v1401_v63 = vsel %vm3773_vm7, %v1399_v1, %v1400_v54  ;;  %v1486_v56 = vunpack.c.l.b16 %v1405_v21  ;;  %v1487_v1 = vunpack.c.l.b16 %v1408_v13  ;;  %v1414_v0 = vrot.slane %v3674_v46, 5 }
  0x7d   : > { %3051 = vmatmul.msk.bf16.gmra.mxu2 %vm979_vm4, %v3807_v55  ;;  %v1485_v60 = vunpack.c.l.b16 %v1401_v63  ;;  %v1412_v32 = vsel %vm3773_vm7, %v3040_v5, %v1411_v24  ;;  %v1418_v5 = vrot.slane %v3461_v19, 5 }
  0x7e   : > { %v3947_v54 = vpack.c.b16 %v1487_v1, %v1486_v56  ;;  %v1415_v13 = vsel %vm3773_vm7, %v1413_v7, %v1414_v0  ;;  %v1488_v56 = vunpack.c.l.b16 %v1412_v32  ;;  %v3329_v32 = vld [vmem:[%s3443_s14 + $0x68] sm:$0x1] }
  0x7f   : > { %v3913_v33 = vpack.c.b16 %v1485_v60, %v1484_v23  ;;  %v3957_v60 = vld [vmem:[%s3443_s14 + $0x54] sm:$0xff]  ;;  %v1489_v46 = vunpack.c.l.b16 %v1415_v13  ;;  %v1421_v13 = vrot.slane %v3329_v32, 5 }
  0x80   : > { %4588 = vst [vmem:[#allocation21_spill] sm:$0xff] %v3947_v54 }
  0x81   : > { %4589 = vst [vmem:[#allocation22_spill] sm:$0xff] %v3957_v60 }
  0x82   : > { %3072 = vmatmul.msk.bf16.gmra.mxu3 %vm979_vm4, %v3819_v6 }
  0x87   : > { %3089 = vmatmul.msk.bf16.gmra.mxu0 %vm979_vm4, %v3710_v45 }
  0x88   : > { %3019 = vmatmul.msk.bf16.gmra.mxu1 %vm979_vm4, %v3819_v6 }
  0x8d   : > { %3052 = vmatmul.msk.bf16.gmra.mxu2 %vm979_vm4, %v3833_v52 }
  0x92   : > { %3073 = vmatmul.msk.bf16.gmra.mxu3 %vm979_vm4, %v3839_v41 }
  0x97   : > { %3090 = vmatmul.msk.bf16.gmra.mxu0 %vm979_vm4, %v3800_v20 }
  0x98   : > { %3020 = vmatmul.msk.bf16.gmra.mxu1 %vm979_vm4, %v3839_v41 }
  0x9d   : > { %v3856_v22 = vpop.f32.mrf.mxu1  ;;  %3053 = vmatmul.msk.bf16.gmra.mxu2 %vm979_vm4, %v3853_v40 }
  0xa2   : > { %3074 = vmatmul.msk.bf16.gmra.mxu3 %vm979_vm4, %v3861_v8 }
  0xa5   : > { %v3871_v43 = vpop.f32.mrf.mxu1 }
  0xa7   : > { %v3873_v16 = vpop.f32.mrf.mxu2  ;;  %3091 = vmatmul.msk.bf16.gmra.mxu0 %vm979_vm4, %v3482_v62 }
  0xa8   : > { %3021 = vmatmul.msk.bf16.gmra.mxu1 %vm979_vm4, %v3861_v8 }
  0xaa   : > { %v3879_v10 = vpop.f32.mrf.mxu0 }
  0xab   : > { %v3883_v61 = vpop.f32.mrf.mxu3 }
  0xac   : > { %4583 = vst [vmem:[#allocation16_spill] sm:$0xff] %v3883_v61 }
  0xad   : > { %3054 = vmatmul.msk.bf16.gmra.mxu2 %vm979_vm4, %v3881_v12 }
  0xaf   : > { %v3891_v9 = vpop.f32.mrf.mxu1  ;;  %v3895_v57 = vpop.f32.mrf.mxu2 }
  0xb2   : > { %3075 = vmatmul.msk.bf16.gmra.mxu3 %vm979_vm4, %v3889_v27  ;;  %v3903_v31 = vpop.f32.mrf.mxu0 }
  0xb3   : > { %v3905_v17 = vpop.f32.mrf.mxu3 }
  0xb4   : > { %4584 = vst [vmem:[#allocation17_spill] sm:$0xff] %v3905_v17 }
  0xb7   : > { %3092 = vmatmul.msk.bf16.gmra.mxu0 %vm979_vm4, %v3556_v37  ;;  %v3909_v29 = vpop.f32.mrf.mxu1 }
  0xb8   : > { %3022 = vmatmul.msk.bf16.gmra.mxu1 %vm979_vm4, %v3889_v27 }
  0xba   : > { %v3915_v59 = vpop.f32.mrf.mxu2 }
  0xbd   : > { %3055 = vmatmul.msk.bf16.gmra.mxu2 %vm979_vm4, %v3913_v33 }
  0xbe   : > { %v3918_v39 = vpop.f32.mrf.mxu0 }
  0xbf   : > { %v3925_v2 = vpop.f32.mrf.mxu3 }
  0xc0   : > { %4586 = vst [vmem:[#allocation19_spill] sm:$0xff] %v3925_v2 }
  0xc1   : > { %v3929_v48 = vpop.f32.mrf.mxu1 }
  0xc2   : > { %3076 = vmatmul.msk.bf16.gmra.mxu3 %vm979_vm4, %v3923_v35  ;;  %v3933_v3 = vpop.f32.mrf.mxu2 }
  0xc6   : > { %v3939_v58 = vpop.f32.mrf.mxu0 }
  0xc7   : > { %3093 = vmatmul.msk.bf16.gmra.mxu0 %vm979_vm4, %v3641_v44  ;;  %v3943_v15 = vpop.f32.mrf.mxu3 }
  0xc8   : > { %4587 = vst [vmem:[#allocation20_spill] sm:$0xff] %v3943_v15  ;;  %3023 = vmatmul.msk.bf16.gmra.mxu1 %vm979_vm4, %v3923_v35  ;;  %v3992_v15 = vld [vmem:[%s3443_s14 + $0x60] sm:$0xff] }
  0xc9   : > { %v3950_v63 = vpop.f32.mrf.mxu1  ;;  %4593 = vst [vmem:[#allocation26_spill] sm:$0xff] %v3992_v15 }
  0xcd   : > { %v3952_v23 = vpop.f32.mrf.mxu2  ;;  %3056 = vmatmul.msk.bf16.gmra.mxu2 %vm979_vm4, %v3947_v54 }
  0xd0   : > { %v3961_v11 = vpop.f32.mrf.mxu0 }
  0xd1   : > { %v3963_v21 = vpop.f32.mrf.mxu3 }
  0xd2   : > { %4590 = vst [vmem:[#allocation23_spill] sm:$0xff] %v3963_v21  ;;  %3077 = vmatmul.msk.bf16.gmra.mxu3 %vm979_vm4, %v3957_v60  ;;  %v3979_v21 = vpack.c.b16 %v1489_v46, %v1488_v56 }
  0xd4   : > { %4591 = vst [vmem:[#allocation24_spill] sm:$0xff] %v3979_v21 }
  0xd5   : > { %v3971_v26 = vpop.f32.mrf.mxu1  ;;  %v3973_v1 = vpop.f32.mrf.mxu2 }
  0xd7   : > { %3094 = vmatmul.msk.bf16.gmra.mxu0 %vm979_vm4, %v3732_v42  ;;  %v3330_v42 = vld [vmem:[%s3443_s14 + $0x60] sm:$0xf] }
  0xd8   : > { %3024 = vmatmul.msk.bf16.gmra.mxu1 %vm979_vm4, %v3957_v60  ;;  %v3981_v24 = vpop.f32.mrf.mxu0  ;;  %v3041_v2 = vrot.slane %v3330_v42, 9  ;;  %v1420_v60 = vrot.slane %v1418_v5, 4 }
  0xd9   : > { %v3984_v7 = vpop.f32.mrf.mxu3 }
  0xda   : > { %4592 = vst [vmem:[#allocation25_spill] sm:$0xff] %v3984_v7  ;;  %v1419_v19 = vsel %vm3773_vm7, %v3041_v2, %v1418_v5  ;;  %v1422_v46 = vsel %vm3773_vm7, %v1420_v60, %v1421_v13  ;;  %v1425_v60 = vrot.slane %v3529_v47, 5 }
  0xdb   : > { %v1490_v17 = vunpack.c.l.b16 %v1419_v19  ;;  %v1491_v42 = vunpack.c.l.b16 %v1422_v46  ;;  %v4025_v19 = vld [vmem:[%s3443_s14 + $0x6c] sm:$0xff] }
  0xdd   : > { %3057 = vmatmul.msk.bf16.gmra.mxu2 %vm979_vm4, %v3979_v21  ;;  %v3988_v0 = vpop.f32.mrf.mxu1  ;;  %v4014_v2 = vpack.c.b16 %v1491_v42, %v1490_v17  ;;  %v1427_v17 = vrot.slane %v1425_v60, 4 }
  0xdf   : > { %4595 = vst [vmem:[#allocation28_spill] sm:$0xff] %v4014_v2 }
  0xe0   : > { %v3995_v56 = vpop.f32.mrf.mxu2 }
  0xe2   : > { %3078 = vmatmul.msk.bf16.gmra.mxu3 %vm979_vm4, %v3992_v15 }
  0xe4   : > { %v4003_v7 = vpop.f32.mrf.mxu0 }
  0xe5   : > { %v4005_v32 = vpop.f32.mrf.mxu3  ;;  %v1261_v21 = vpop.f32.mrf.mxu1 }
  0xe6   : > { %4594 = vst [vmem:[#allocation27_spill] sm:$0xff] %v4005_v32  ;;  %v1262_v54 = vadd.f32 %v1261_v21, %v3879_v10  ;;  %v1428_v21 = vrot.slane %v3536_v51, 5  ;;  %v3042_v32 = vrot.slane %v3522_v38, 9 }
  0xe7   : > { %3095 = vmatmul.msk.bf16.gmra.mxu0 %vm979_vm4, %v3501_v18 }
  0xe8   : > { %v4010_v44 = vpop.f32.mrf.mxu2  ;;  %3025 = vmatmul.msk.bf16.gmra.mxu1 %vm979_vm4, %v3992_v15  ;;  %v1426_v47 = vsel %vm3773_vm7, %v3042_v32, %v1425_v60 }
  0xe9   : > { %v1492_v61 = vunpack.c.l.b16 %v1426_v47 }
  0xec   : > { %v4017_v5 = vpop.f32.mrf.mxu0 }
  0xed   : > { %v4019_v13 = vpop.f32.mrf.mxu3  ;;  %3058 = vmatmul.msk.bf16.gmra.mxu2 %vm979_vm4, %v4014_v2  ;;  %v1263_v10 = vpop.f32.mrf.mxu1 }
  0xee   : > { %4596 = vst [vmem:[#allocation29_spill] sm:$0xff] %v4019_v13  ;;  %v1264_v46 = vadd.f32 %v1263_v10, %v3903_v31  ;;  %v1429_v13 = vsel %vm3773_vm7, %v1427_v17, %v1428_v21  ;;  %v1432_v21 = vrot.slane %v3601_v34, 5 }
  0xef   : > { %v1493_v35 = vunpack.c.l.b16 %v1429_v13  ;;  %v1435_v13 = vrot.slane %v3608_v50, 5 }
  0xf0   : > { %v1582_v42 = vpop.f32.mrf.mxu2 }
  0xf1   : > { %v1662_v18 = vadd.f32 %v1582_v42, %v1262_v54  ;;  %v4042_v10 = vpack.c.b16 %v1493_v35, %v1492_v61  ;;  %v4049_v42 = vld [vmem:[%s3443_s14 + $0x78] sm:$0xff] }
  0xf2   : > { %3079 = vmatmul.msk.bf16.gmra.mxu3 %vm979_vm4, %v4025_v19 }
  0xf4   : > { %v1872_v2 = vpop.f32.mrf.mxu0 }
  0xf5   : > { %v1716_v51 = vpop.f32.mrf.mxu3  ;;  %v1266_v15 = vpop.f32.mrf.mxu1 }
  0xf6   : > { %v1796_v31 = vadd.f32 %v1716_v51, %v1662_v18  ;;  %v1267_v38 = vadd.f32 %v1266_v15, %v3918_v39 }
  0xf7   : > { %3096 = vmatmul.msk.bf16.gmra.mxu0 %vm979_vm4, %v3581_v4 }
  0xf8   : > { %v1584_v54 = vpop.f32.mrf.mxu2  ;;  %3026 = vmatmul.msk.bf16.gmra.mxu1 %vm979_vm4, %v4025_v19  ;;  %v4040_v32 = vadd.f32 %v1872_v2, %v1796_v31  ;;  %v3043_v2 = vrot.slane %v3597_v28, 9 }
  0xf9   : > { %v1663_v60 = vadd.f32 %v1584_v54, %v1264_v46  ;;  %v1434_v46 = vrot.slane %v1432_v21, 4 }
  0xfa   : > { %v1433_v50 = vsel %vm3773_vm7, %v3043_v2, %v1432_v21 }
  0xfb   : > { %v1436_v51 = vsel %vm3773_vm7, %v1434_v46, %v1435_v13  ;;  %v1442_v46 = vrot.slane %v3696_v49, 5 }
  0xfc   : > { %v1874_v17 = vpop.f32.mrf.mxu0 }
  0xfd   : > { %v1718_v18 = vpop.f32.mrf.mxu3  ;;  %3059 = vmatmul.msk.bf16.gmra.mxu2 %vm979_vm4, %v4042_v10  ;;  %v1268_v39 = vpop.f32.mrf.mxu1 }
  0xfe   : > { %v1797_v15 = vadd.f32 %v1718_v18, %v1663_v60  ;;  %v1269_v47 = vadd.f32 %v1268_v39, %v3939_v58  ;;  %v1494_v58 = vunpack.c.l.b16 %v1433_v50  ;;  %v1495_v18 = vunpack.c.l.b16 %v1436_v51  ;;  %v4075_v50 = vld [vmem:[%s3443_s14 + $0x84] sm:$0xff] }
 0x100   : > { %v1587_v61 = vpop.f32.mrf.mxu2  ;;  %v4053_v35 = vadd.f32 %v1874_v17, %v1797_v15  ;;  %v4068_v13 = vpack.c.b16 %v1495_v18, %v1494_v58  ;;  %v1439_v15 = vrot.slane %v3691_v30, 5 }
 0x101   : > { %v1664_v34 = vadd.f32 %v1587_v61, %v1267_v38 }
 0x102   : > { %3080 = vmatmul.msk.bf16.gmra.mxu3 %vm979_vm4, %v4049_v42 }
 0x104   : > { %v1877_v31 = vpop.f32.mrf.mxu0 }
 0x105   : > { %v1721_v54 = vpop.f32.mrf.mxu3  ;;  %v1271_v60 = vpop.f32.mrf.mxu1 }
 0x106   : > { %v1798_v28 = vadd.f32 %v1721_v54, %v1664_v34  ;;  %v1272_v17 = vadd.f32 %v1271_v60, %v3961_v11 }
 0x107   : > { %3097 = vmatmul.msk.bf16.gmra.mxu0 %vm979_vm4, %v3666_v25 }
 0x108   : > { %v1589_v38 = vpop.f32.mrf.mxu2  ;;  %3027 = vmatmul.msk.bf16.gmra.mxu1 %vm979_vm4, %v4049_v42  ;;  %v4066_v21 = vadd.f32 %v1877_v31, %v1798_v28  ;;  %v4597_v31 = vld [vmem:[#allocation9_spill] sm:$0xff] }
 0x109   : > { %v1665_v39 = vadd.f32 %v1589_v38, %v1269_v47  ;;  %v3044_v54 = vrot.slane %v4597_v31, 9  ;;  %v1441_v47 = vrot.slane %v1439_v15, 4 }
 0x10b   : > { %v1440_v49 = vsel %vm3773_vm7, %v3044_v54, %v1439_v15  ;;  %v1443_v18 = vsel %vm3773_vm7, %v1441_v47, %v1442_v46  ;;  %v3331_v54 = vld [vmem:[%s3443_s14 + $0x94] sm:$0xf] }
 0x10c   : > { %v1879_v2 = vpop.f32.mrf.mxu0  ;;  %v1446_v47 = vrot.slane %v3331_v54, 5 }
 0x10d   : > { %v1723_v61 = vpop.f32.mrf.mxu3  ;;  %3060 = vmatmul.msk.bf16.gmra.mxu2 %vm979_vm4, %v4068_v13  ;;  %v1273_v11 = vpop.f32.mrf.mxu1 }
 0x10e   : > { %v1799_v34 = vadd.f32 %v1723_v61, %v1665_v39  ;;  %v1274_v51 = vadd.f32 %v1273_v11, %v3981_v24  ;;  %v1496_v39 = vunpack.c.l.b16 %v1440_v49  ;;  %v1497_v61 = vunpack.c.l.b16 %v1443_v18 }
 0x110   : > { %v1592_v60 = vpop.f32.mrf.mxu2  ;;  %v4079_v58 = vadd.f32 %v1879_v2, %v1799_v34  ;;  %v4094_v31 = vpack.c.b16 %v1497_v61, %v1496_v39 }
 0x111   : > { %v1666_v30 = vadd.f32 %v1592_v60, %v1272_v17  ;;  %v4599_v17 = vld [vmem:[#allocation15_spill] sm:$0xff] }
 0x112   : > { %4598 = vst [vmem:[#allocation9_spill] sm:$0xff] %v4079_v58  ;;  %3081 = vmatmul.msk.bf16.gmra.mxu3 %vm979_vm4, %v4075_v50 }
 0x113   : > { %4601 = vst [vmem:[#allocation31_spill] sm:$0xff] %v4094_v31 }
 0x114   : > { %v1882_v28 = vpop.f32.mrf.mxu0 }
 0x115   : > { %v1726_v24 = vpop.f32.mrf.mxu3  ;;  %v1276_v38 = vpop.f32.mrf.mxu1 }
 0x116   : > { %v1800_v11 = vadd.f32 %v1726_v24, %v1666_v30  ;;  %v1277_v2 = vadd.f32 %v1276_v38, %v4003_v7  ;;  %v3332_v30 = vld [vmem:[%s3443_s14 + $0x98] sm:$0x1]  ;;  %v4101_v38 = vld [vmem:[%s3443_s14 + $0x90] sm:$0xff] }
 0x117   : > { %3098 = vmatmul.msk.bf16.gmra.mxu0 %vm979_vm4, %v4599_v17  ;;  %v1449_v49 = vrot.slane %v3332_v30, 5  ;;  %4602 = vst [vmem:[#allocation32_spill] sm:$0xff] %v4101_v38 }
 0x118   : > { %v1594_v34 = vpop.f32.mrf.mxu2  ;;  %3028 = vmatmul.msk.bf16.gmra.mxu1 %vm979_vm4, %v4075_v50  ;;  %v4092_v15 = vadd.f32 %v1882_v28, %v1800_v11  ;;  %v3333_v28 = vld [vmem:[%s3443_s14 + $0x90] sm:$0xf] }
 0x119   : > { %v1667_v46 = vadd.f32 %v1594_v34, %v1274_v51  ;;  %v3045_v11 = vrot.slane %v3333_v28, 9  ;;  %v1448_v51 = vrot.slane %v1446_v47, 4 }
 0x11a   : > { %4600 = vst [vmem:[#allocation30_spill] sm:$0xff] %v4092_v15 }
 0x11b   : > { %v1447_v54 = vsel %vm3773_vm7, %v3045_v11, %v1446_v47  ;;  %v3334_v11 = vld [vmem:[%s3443_s14 + $0xa0] sm:$0xf] }
 0x11c   : > { %v1884_v60 = vpop.f32.mrf.mxu0 }
 0x11d   : > { %v1728_v7 = vpop.f32.mrf.mxu3  ;;  %3061 = vmatmul.msk.bf16.gmra.mxu2 %vm979_vm4, %v4094_v31  ;;  %v1278_v18 = vpop.f32.mrf.mxu1  ;;  %v3336_v31 = vld [vmem:[%s3443_s14 + $0x9c] sm:$0xf] }
 0x11e   : > { %v1801_v24 = vadd.f32 %v1728_v7, %v1667_v46  ;;  %v1279_v58 = vadd.f32 %v1278_v18, %v4017_v5  ;;  %v1450_v46 = vsel %vm3773_vm7, %v1448_v51, %v1449_v49  ;;  %v1498_v18 = vunpack.c.l.b16 %v1447_v54 }
 0x11f   : > { %v1499_v28 = vunpack.c.l.b16 %v1450_v46  ;;  %v1453_v51 = vrot.slane %v3334_v11, 5  ;;  %v3335_v46 = vld [vmem:[%s3443_s14 + $0xa4] sm:$0x1] }
 0x120   : > { %v1597_v39 = vpop.f32.mrf.mxu2  ;;  %v4105_v61 = vadd.f32 %v1884_v60, %v1801_v24  ;;  %v4604_v60 = vld [vmem:[#allocation3_spill] sm:$0xff] }
 0x121   : > { %v1668_v34 = vadd.f32 %v1597_v39, %v1277_v2  ;;  %v4119_v49 = vpack.c.b16 %v1499_v28, %v1498_v18 }
 0x122   : > { %4603 = vst [vmem:[#allocation33_spill] sm:$0xff] %v4105_v61  ;;  %3082 = vmatmul.msk.bf16.gmra.mxu3 %vm979_vm4, %v4101_v38 }
 0x123   : > { %4606 = vst [vmem:[#allocation35_spill] sm:$0xff] %v4119_v49 }
 0x124   : > { %v1887_v30 = vpop.f32.mrf.mxu0 }
 0x125   : > { %v1731_v7 = vpop.f32.mrf.mxu3  ;;  %v1281_v5 = vpop.f32.mrf.mxu1 }
 0x126   : > { %v1802_v15 = vadd.f32 %v1731_v7, %v1668_v34  ;;  %v1456_v7 = vrot.slane %v3335_v46, 5 }
 0x127   : > { %3099 = vmatmul.msk.bf16.gmra.mxu0 %vm979_vm4, %v4604_v60  ;;  %v4126_v60 = vld [vmem:[%s3443_s14 + $0x9c] sm:$0xff] }
 0x128   : > { %v1599_v2 = vpop.f32.mrf.mxu2  ;;  %3029 = vmatmul.msk.bf16.gmra.mxu1 %vm979_vm4, %v4101_v38  ;;  %v4117_v47 = vadd.f32 %v1887_v30, %v1802_v15  ;;  %4607 = vst [vmem:[#allocation36_spill] sm:$0xff] %v4126_v60  ;;  %v3046_v38 = vrot.slane %v3336_v31, 9  ;;  %v1455_v15 = vrot.slane %v1453_v51, 4 }
 0x129   : > { %v1669_v24 = vadd.f32 %v1599_v2, %v1279_v58  ;;  %v1282_v58 = vadd.f32 %v1281_v5, %v3856_v22  ;;  %v4609_v5 = vld [vmem:[#allocation4_spill] sm:$0xff] }
 0x12a   : > { %4605 = vst [vmem:[#allocation34_spill] sm:$0xff] %v4117_v47  ;;  %v1454_v2 = vsel %vm3773_vm7, %v3046_v38, %v1453_v51 }
 0x12b   : > { %v1500_v31 = vunpack.c.l.b16 %v1454_v2 }
 0x12c   : > { %v1889_v39 = vpop.f32.mrf.mxu0 }
 0x12d   : > { %v1733_v54 = vpop.f32.mrf.mxu3  ;;  %3062 = vmatmul.msk.bf16.gmra.mxu2 %vm979_vm4, %v4119_v49  ;;  %v1283_v34 = vpop.f32.mrf.mxu1 }
 0x12e   : > { %v1803_v61 = vadd.f32 %v1733_v54, %v1669_v24  ;;  %v1457_v24 = vsel %vm3773_vm7, %v1455_v15, %v1456_v7  ;;  %v4612_v15 = vld [vmem:[#allocation6_spill] sm:$0xff] }
 0x12f   : > { %v1501_v47 = vunpack.c.l.b16 %v1457_v24  ;;  %v4613_v24 = vld [vmem:[#allocation7_spill] sm:$0xff] }
 0x130   : > { %v1602_v30 = vpop.f32.mrf.mxu2  ;;  %v4130_v18 = vadd.f32 %v1889_v39, %v1803_v61  ;;  %v1284_v61 = vadd.f32 %v1283_v34, %v3871_v43  ;;  %v1463_v43 = vrot.slane %v4613_v24, 5 }
 0x131   : > { %v1670_v28 = vadd.f32 %v1602_v30, %v1282_v58  ;;  %v4145_v7 = vpack.c.b16 %v1501_v47, %v1500_v31  ;;  %v1460_v58 = vrot.slane %v4612_v15, 5 }
 0x132   : > { %4608 = vst [vmem:[#allocation37_spill] sm:$0xff] %v4130_v18  ;;  %3083 = vmatmul.msk.bf16.gmra.mxu3 %vm979_vm4, %v4126_v60  ;;  %v4615_v18 = vld [vmem:[#allocation5_spill] sm:$0xff] }
 0x133   : > { %4611 = vst [vmem:[#allocation39_spill] sm:$0xff] %v4145_v7 }
 0x134   : > { %v1892_v11 = vpop.f32.mrf.mxu0 }
 0x135   : > { %v1736_v54 = vpop.f32.mrf.mxu3  ;;  %v1286_v46 = vpop.f32.mrf.mxu1 }
 0x136   : > { %v1804_v22 = vadd.f32 %v1736_v54, %v1670_v28  ;;  %v4152_v54 = vld [vmem:[%s3443_s14 + $0xa8] sm:$0xff]  ;;  %v1287_v47 = vadd.f32 %v1286_v46, %v3891_v9  ;;  %v4617_v46 = vld [vmem:[#allocation10_spill] sm:$0xff] }
 0x137   : > { %3100 = vmatmul.msk.bf16.gmra.mxu0 %vm979_vm4, %v4609_v5  ;;  %4614 = vst [vmem:[#allocation6_spill] sm:$0xff] %v4152_v54 }
 0x138   : > { %v1604_v39 = vpop.f32.mrf.mxu2  ;;  %3030 = vmatmul.msk.bf16.gmra.mxu1 %vm979_vm4, %v4126_v60  ;;  %v4143_v38 = vadd.f32 %v1892_v11, %v1804_v22  ;;  %v3047_v11 = vrot.slane %v4615_v18, 9  ;;  %v1462_v22 = vrot.slane %v1460_v58, 4 }
 0x139   : > { %v1671_v51 = vadd.f32 %v1604_v39, %v1284_v61 }
 0x13a   : > { %4610 = vst [vmem:[#allocation38_spill] sm:$0xff] %v4143_v38  ;;  %v1461_v15 = vsel %vm3773_vm7, %v3047_v11, %v1460_v58 }
 0x13b   : > { %v1502_v38 = vunpack.c.l.b16 %v1461_v15 }
 0x13c   : > { %v1894_v30 = vpop.f32.mrf.mxu0 }
 0x13d   : > { %v1738_v2 = vpop.f32.mrf.mxu3  ;;  %3063 = vmatmul.msk.bf16.gmra.mxu2 %vm979_vm4, %v4145_v7  ;;  %v1288_v28 = vpop.f32.mrf.mxu1 }
 0x13e   : > { %v1805_v34 = vadd.f32 %v1738_v2, %v1671_v51  ;;  %v1464_v51 = vsel %vm3773_vm7, %v1462_v22, %v1463_v43  ;;  %v1289_v58 = vadd.f32 %v1288_v28, %v3909_v29  ;;  %v4176_v43 = vld [vmem:[%s4168_s30] sm:$0xf] }
 0x13f   : > { %v1503_v7 = vunpack.c.l.b16 %v1464_v51  ;;  %4618 = vst [vmem:[#allocation5_spill] sm:$0xff] %v4176_v43  ;;  %v1829_v15 = vshrl.u32 %v4176_v43, 16  ;;  %v1832_v29 = vshll.u32 %v4176_v43, 16 }
 0x140   : > { %v1607_v31 = vpop.f32.mrf.mxu2  ;;  %v4156_v61 = vadd.f32 %v1894_v30, %v1805_v34 }
 0x141   : > { %v1672_v39 = vadd.f32 %v1607_v31, %v1287_v47  ;;  %v4180_v22 = vpack.c.b16 %v1503_v7, %v1502_v38  ;;  %v4183_v47 = vld [vmem:[%s4168_s30 + $0x4] sm:$0xf]  ;;  %v4622_v31 = vld [vmem:[#allocation12_spill] sm:$0xff]  ;;  %v4623_v7 = vld [vmem:[#allocation13_spill] sm:$0xff]  ;;  %v1834_v5 = vrot.slane %v1832_v29, 5 }
 0x142   : > { %4616 = vst [vmem:[#allocation7_spill] sm:$0xff] %v4156_v61  ;;  %3084 = vmatmul.msk.bf16.gmra.mxu3 %vm979_vm4, %v4152_v54  ;;  %v1838_v28 = vshll.u32 %v4183_v47, 16 }
 0x143   : > { %4620 = vst [vmem:[#allocation41_spill] sm:$0xff] %v4180_v22 }
 0x144   : > { %v1897_v2 = vpop.f32.mrf.mxu0  ;;  %4621 = vst [vmem:[#allocation42_spill] sm:$0xff] %v4183_v47 }
 0x145   : > { %v1741_v24 = vpop.f32.mrf.mxu3  ;;  %v1291_v18 = vpop.f32.mrf.mxu1 }
 0x146   : > { %v1806_v9 = vadd.f32 %v1741_v24, %v1672_v39  ;;  %v1467_v39 = vrot.slane %v4622_v31, 5  ;;  %v1842_v24 = vshrl.u32 %v4183_v47, 16  ;;  %v1292_v43 = vadd.f32 %v1291_v18, %v3929_v48 }
 0x147   : > { %3101 = vmatmul.msk.bf16.gmra.mxu0 %vm979_vm4, %v4617_v46  ;;  %v1831_v46 = vrot.slane %v1829_v15, 4  ;;  %v1840_v47 = vrot.slane %v1838_v28, 5 }
 0x148   : > { %v1609_v30 = vpop.f32.mrf.mxu2  ;;  %3031 = vmatmul.msk.bf16.gmra.mxu1 %vm979_vm4, %v4152_v54  ;;  %v4178_v34 = vadd.f32 %v1897_v2, %v1806_v9  ;;  %v1470_v2 = vrot.slane %v4623_v7, 5  ;;  %v1844_v60 = vrot.slane %v1842_v24, 4 }
 0x149   : > { %v1673_v11 = vadd.f32 %v1609_v30, %v1289_v58  ;;  %v4194_v58 = vld [vmem:[%s3443_s14 + $0xb4] sm:$0xff]  ;;  %v4624_v30 = vld [vmem:[#allocation11_spill] sm:$0xff]  ;;  %v1835_v18 = vor.u32 %v1834_v5, %v1831_v46 }
 0x14a   : > { %4619 = vst [vmem:[#allocation40_spill] sm:$0xff] %v4178_v34  ;;  %v3048_v31 = vrot.slane %v4624_v30, 9  ;;  %v1469_v34 = vrot.slane %v1467_v39, 4  ;;  %v1845_v15 = vor.u32 %v1844_v60, %v1840_v47 }
 0x14c   : > { %v1899_v51 = vpop.f32.mrf.mxu0  ;;  %v1846_v5 = vrot.slane %v1845_v15, 4 }
 0x14d   : > { %v1743_v61 = vpop.f32.mrf.mxu3  ;;  %3064 = vmatmul.msk.bf16.gmra.mxu2 %vm979_vm4, %v4180_v22  ;;  %v1293_v38 = vpop.f32.mrf.mxu1  ;;  %v4201_v22 = vld [vmem:[%s4168_s30 + $0x8] sm:$0x1] }
 0x14e   : > { %v1807_v9 = vadd.f32 %v1743_v61, %v1673_v11  ;;  %v1468_v61 = vsel %vm3773_vm7, %v3048_v31, %v1467_v39  ;;  %v1471_v11 = vsel %vm3773_vm7, %v1469_v34, %v1470_v2  ;;  %v1848_v29 = vshll.u32 %v4201_v22, 16 }
 0x14f   : > { %v1504_v24 = vunpack.c.l.b16 %v1468_v61  ;;  %v1294_v7 = vadd.f32 %v1293_v38, %v3950_v63  ;;  %v1836_v34 = vrot.slane %v1835_v18, 4 }
 0x150   : > { %v1612_v54 = vpop.f32.mrf.mxu2  ;;  %v4198_v49 = vadd.f32 %v1899_v51, %v1807_v9  ;;  %v1850_v60 = vrot.slane %v1848_v29, 5 }
 0x151   : > { %v1674_v17 = vadd.f32 %v1612_v54, %v1292_v43  ;;  %v1505_v54 = vunpack.c.l.b16 %v1471_v11  ;;  %v4226_v11 = vld [vmem:[%s4168_s30] sm:$0xff] }
 0x152   : > { %3085 = vmatmul.msk.bf16.gmra.mxu3 %vm979_vm4, %v4194_v58  ;;  %v1851_v63 = vsel %vm3470_vm3, %v1846_v5, %v1850_v60 }
 0x153   : > { %v4217_v9 = vpack.c.b16 %v1505_v54, %v1504_v24  ;;  %v1855_v15 = vunpack.c.l.b16 %v1851_v63 }
 0x154   : > { %v1902_v48 = vpop.f32.mrf.mxu0 }
 0x155   : > { %v1746_v28 = vpop.f32.mrf.mxu3  ;;  %v1296_v51 = vpop.f32.mrf.mxu1 }
 0x156   : > { %v1808_v43 = vadd.f32 %v1746_v28, %v1674_v17  ;;  %v1841_v17 = vsel %vm3470_vm3, %v1836_v34, %v1840_v47 }
 0x157   : > { %3102 = vmatmul.msk.bf16.gmra.mxu0 %vm979_vm4, %v3782_v53  ;;  %v1854_v18 = vunpack.c.l.b16 %v1841_v17 }
 0x158   : > { %v1614_v39 = vpop.f32.mrf.mxu2  ;;  %3032 = vmatmul.msk.bf16.gmra.mxu1 %vm979_vm4, %v4194_v58  ;;  %v4215_v46 = vadd.f32 %v1902_v48, %v1808_v43  ;;  %v1297_v48 = vadd.f32 %v1296_v51, %v3971_v26 }
 0x159   : > { %v1675_v2 = vadd.f32 %v1614_v39, %v1294_v7  ;;  %v4233_v47 = vpack.c.b16 %v1855_v15, %v1854_v18 }
 0x15c   : > { %v1904_v30 = vpop.f32.mrf.mxu0 }
 0x15d   : > { %v1748_v38 = vpop.f32.mrf.mxu3  ;;  %3065 = vmatmul.msk.bf16.gmra.mxu2 %vm979_vm4, %v4217_v9  ;;  %v1298_v31 = vpop.f32.mrf.mxu1 }
 0x15e   : > { %v1809_v61 = vadd.f32 %v1748_v38, %v1675_v2  ;;  %v1299_v26 = vadd.f32 %v1298_v31, %v3988_v0 }
 0x160   : > { %v1617_v29 = vpop.f32.mrf.mxu2  ;;  %v4229_v28 = vadd.f32 %v1904_v30, %v1809_v61 }
 0x161   : > { %v1676_v24 = vadd.f32 %v1617_v29, %v1297_v48 }
 0x162   : > { %3086 = vmatmul.msk.bf16.gmra.mxu3 %vm979_vm4, %v4226_v11 }
 0x164   : > { %v1907_v54 = vpop.f32.mrf.mxu0 }
 0x165   : > { %v1751_v43 = vpop.f32.mrf.mxu3  ;;  %v1301_v7 = vpop.f32.mrf.mxu1 }
 0x166   : > { %v1810_v39 = vadd.f32 %v1751_v43, %v1676_v24  ;;  %v1302_v63 = vadd.f32 %v1301_v7, %v3873_v16 }
 0x167   : > { %3103 = vmatmul.msk.bf16.gmra.mxu0 %vm979_vm4, %v4233_v47 }
 0x168   : > { %v1619_v51 = vpop.f32.mrf.mxu2  ;;  %3106 = vmatmul.msk.bf16.vlgmr.msra.gmra.mxu1 %vm979_vm4, %v3807_v55  ;;  %v4240_v34 = vadd.f32 %v1907_v54, %v1810_v39 }
 0x169   : > { %v1677_v5 = vadd.f32 %v1619_v51, %v1299_v26 }
 0x16c   : > { %v1909_v60 = vpop.f32.mrf.mxu0 }
 0x16d   : > { %v1753_v2 = vpop.f32.mrf.mxu3  ;;  %3127 = vmatmul.msk.bf16.vlgmr.msra.gmra.mxu2 %vm979_vm4, %v3819_v6  ;;  %v1303_v30 = vpop.f32.mrf.mxu1 }
 0x16e   : > { %v1811_v17 = vadd.f32 %v1753_v2, %v1677_v5  ;;  %v1304_v6 = vadd.f32 %v1303_v30, %v3895_v57 }
 0x170   : > { %v1622_v38 = vpop.f32.mrf.mxu2  ;;  %v4245_v61 = vadd.f32 %v1909_v60, %v1811_v17 }
 0x171   : > { %v1678_v0 = vadd.f32 %v1622_v38, %v1302_v63 }
 0x172   : > { %3144 = vmatmul.msk.bf16.vlgmr.msra.gmra.mxu3 %vm979_vm4, %v3710_v45 }
 0x174   : > { %v1912_v55 = vpop.f32.mrf.mxu0 }
 0x175   : > { %v1756_v31 = vpop.f32.mrf.mxu3  ;;  %v1306_v48 = vpop.f32.mrf.mxu1 }
 0x176   : > { %v1812_v18 = vadd.f32 %v1756_v31, %v1678_v0  ;;  %v1307_v7 = vadd.f32 %v1306_v48, %v3915_v59 }
 0x177   : > { %3162 = vmatmul.msk.bf16.vlgmr.msra.gmra.mxu0 %vm979_vm4, %v3833_v52 }
 0x178   : > { %v1624_v15 = vpop.f32.mrf.mxu2  ;;  %3107 = vmatmul.msk.bf16.gmra.mxu1 %vm979_vm4, %v3833_v52  ;;  %v4254_v16 = vadd.f32 %v1912_v55, %v1812_v18 }
 0x179   : > { %v1679_v29 = vadd.f32 %v1624_v15, %v1304_v6 }
 0x17c   : > { %v1914_v24 = vpop.f32.mrf.mxu0 }
 0x17d   : > { %v1758_v54 = vpop.f32.mrf.mxu3  ;;  %3128 = vmatmul.msk.bf16.gmra.mxu2 %vm979_vm4, %v3839_v41  ;;  %v1308_v45 = vpop.f32.mrf.mxu1 }
 0x17e   : > { %v1813_v43 = vadd.f32 %v1758_v54, %v1679_v29  ;;  %v1309_v41 = vadd.f32 %v1308_v45, %v3933_v3 }
 0x180   : > { %v1627_v39 = vpop.f32.mrf.mxu2  ;;  %v4259_v26 = vadd.f32 %v1914_v24, %v1813_v43 }
 0x181   : > { %v1680_v57 = vadd.f32 %v1627_v39, %v1307_v7 }
 0x182   : > { %3145 = vmatmul.msk.bf16.gmra.mxu3 %vm979_vm4, %v3800_v20 }
 0x184   : > { %v1917_v52 = vpop.f32.mrf.mxu0 }
 0x185   : > { %v1761_v51 = vpop.f32.mrf.mxu3  ;;  %v1311_v5 = vpop.f32.mrf.mxu1 }
 0x186   : > { %v1814_v60 = vadd.f32 %v1761_v51, %v1680_v57  ;;  %v1312_v0 = vadd.f32 %v1311_v5, %v3952_v23 }
 0x187   : > { %3163 = vmatmul.msk.bf16.gmra.mxu0 %vm979_vm4, %v3853_v40 }
 0x188   : > { %v1629_v2 = vpop.f32.mrf.mxu2  ;;  %3108 = vmatmul.msk.bf16.gmra.mxu1 %vm979_vm4, %v3853_v40  ;;  %v4268_v59 = vadd.f32 %v1917_v52, %v1814_v60 }
 0x189   : > { %v1681_v30 = vadd.f32 %v1629_v2, %v1309_v41 }
 0x18c   : > { %v1919_v17 = vpop.f32.mrf.mxu0 }
 0x18d   : > { %v1763_v63 = vpop.f32.mrf.mxu3  ;;  %3129 = vmatmul.msk.bf16.gmra.mxu2 %vm979_vm4, %v3861_v8  ;;  %v1313_v20 = vpop.f32.mrf.mxu1 }
 0x18e   : > { %v1815_v38 = vadd.f32 %v1763_v63, %v1681_v30  ;;  %v1314_v8 = vadd.f32 %v1313_v20, %v3973_v1  ;;  %v4625_v30 = vld [vmem:[#allocation18_spill] sm:$0xff]  ;;  %v4626_v63 = vld [vmem:[#allocation16_spill] sm:$0xff] }
 0x190   : > { %v1632_v55 = vpop.f32.mrf.mxu2  ;;  %v4273_v31 = vadd.f32 %v1919_v17, %v1815_v38 }
 0x191   : > { %v1682_v3 = vadd.f32 %v1632_v55, %v1312_v0  ;;  %v4627_v55 = vld [vmem:[#allocation8_spill] sm:$0xff] }
 0x192   : > { %3146 = vmatmul.msk.bf16.gmra.mxu3 %vm979_vm4, %v3482_v62 }
 0x194   : > { %v1922_v40 = vpop.f32.mrf.mxu0 }
 0x195   : > { %v1766_v48 = vpop.f32.mrf.mxu3  ;;  %v1316_v18 = vpop.f32.mrf.mxu1 }
 0x196   : > { %v1816_v6 = vadd.f32 %v1766_v48, %v1682_v3  ;;  %v1317_v43 = vadd.f32 %v1316_v18, %v3995_v56  ;;  %v4628_v18 = vld [vmem:[#allocation21_spill] sm:$0xff] }
 0x197   : > { %3164 = vmatmul.msk.bf16.gmra.mxu0 %vm979_vm4, %v3881_v12 }
 0x198   : > { %v1634_v15 = vpop.f32.mrf.mxu2  ;;  %3109 = vmatmul.msk.bf16.gmra.mxu1 %vm979_vm4, %v3881_v12  ;;  %v4282_v23 = vadd.f32 %v1922_v40, %v1816_v6  ;;  %v4629_v6 = vld [vmem:[#allocation17_spill] sm:$0xff] }
 0x199   : > { %v1683_v29 = vadd.f32 %v1634_v15, %v1314_v8 }
 0x19c   : > { %v1924_v24 = vpop.f32.mrf.mxu0 }
 0x19d   : > { %v1768_v54 = vpop.f32.mrf.mxu3  ;;  %3130 = vmatmul.msk.bf16.gmra.mxu2 %vm979_vm4, %v3889_v27  ;;  %v1318_v62 = vpop.f32.mrf.mxu1 }
 0x19e   : > { %v1817_v45 = vadd.f32 %v1768_v54, %v1683_v29  ;;  %v1319_v27 = vadd.f32 %v1318_v62, %v4010_v44 }
 0x1a0   : > { %v1637_v7 = vpop.f32.mrf.mxu2  ;;  %v4287_v39 = vadd.f32 %v1924_v24, %v1817_v45  ;;  %v4630_v45 = vld [vmem:[#allocation22_spill] sm:$0xff] }
 0x1a1   : > { %v1684_v1 = vadd.f32 %v1637_v7, %v1317_v43 }
 0x1a2   : > { %3147 = vmatmul.msk.bf16.gmra.mxu3 %vm979_vm4, %v3556_v37 }
 0x1a4   : > { %v1927_v12 = vpop.f32.mrf.mxu0 }
 0x1a5   : > { %v1771_v57 = vpop.f32.mrf.mxu3  ;;  %v1321_v52 = vpop.f32.mrf.mxu1 }
 0x1a6   : > { %v1818_v51 = vadd.f32 %v1771_v57, %v1684_v1  ;;  %v1322_v20 = vadd.f32 %v1321_v52, %v4626_v63  ;;  %v4631_v1 = vld [vmem:[#allocation19_spill] sm:$0xff] }
 0x1a7   : > { %3165 = vmatmul.msk.bf16.gmra.mxu0 %vm979_vm4, %v3913_v33 }
 0x1a8   : > { %v1639_v5 = vpop.f32.mrf.mxu2  ;;  %3110 = vmatmul.msk.bf16.gmra.mxu1 %vm979_vm4, %v3913_v33  ;;  %v4296_v56 = vadd.f32 %v1927_v12, %v1818_v51 }
 0x1a9   : > { %v1685_v60 = vadd.f32 %v1639_v5, %v1319_v27  ;;  %v4632_v27 = vld [vmem:[#allocation14_spill] sm:$0xff] }
 0x1ac   : > { %v1929_v41 = vpop.f32.mrf.mxu0 }
 0x1ad   : > { %v1773_v2 = vpop.f32.mrf.mxu3  ;;  %3131 = vmatmul.msk.bf16.gmra.mxu2 %vm979_vm4, %v4625_v30  ;;  %v1323_v37 = vpop.f32.mrf.mxu1  ;;  %v4633_v30 = vld [vmem:[#allocation24_spill] sm:$0xff] }
 0x1ae   : > { %v1819_v17 = vadd.f32 %v1773_v2, %v1685_v60  ;;  %v1324_v8 = vadd.f32 %v1323_v37, %v4629_v6  ;;  %v4634_v37 = vld [vmem:[#allocation20_spill] sm:$0xff] }
 0x1b0   : > { %v1642_v38 = vpop.f32.mrf.mxu2  ;;  %v4301_v0 = vadd.f32 %v1929_v41, %v1819_v17 }
 0x1b1   : > { %v1686_v44 = vadd.f32 %v1642_v38, %v1322_v20 }
 0x1b2   : > { %3148 = vmatmul.msk.bf16.gmra.mxu3 %vm979_vm4, %v4627_v55 }
 0x1b4   : > { %v1932_v33 = vpop.f32.mrf.mxu0 }
 0x1b5   : > { %v1776_v3 = vpop.f32.mrf.mxu3  ;;  %v1326_v40 = vpop.f32.mrf.mxu1 }
 0x1b6   : > { %v1820_v48 = vadd.f32 %v1776_v3, %v1686_v44  ;;  %v1327_v12 = vadd.f32 %v1326_v40, %v4631_v1  ;;  %v4639_v1 = vld [vmem:[#allocation25_spill] sm:$0xff] }
 0x1b7   : > { %3166 = vmatmul.msk.bf16.gmra.mxu0 %vm979_vm4, %v4628_v18 }
 0x1b8   : > { %v1644_v15 = vpop.f32.mrf.mxu2  ;;  %3111 = vmatmul.msk.bf16.gmra.mxu1 %vm979_vm4, %v4628_v18  ;;  %v4310_v29 = vadd.f32 %v1932_v33, %v1820_v48  ;;  %v4635_v33 = vld [vmem:[#allocation26_spill] sm:$0xff]  ;;  %v4636_v48 = vld [vmem:[#allocation23_spill] sm:$0xff] }
 0x1b9   : > { %v1687_v24 = vadd.f32 %v1644_v15, %v1324_v8 }
 0x1bc   : > { %v1934_v54 = vpop.f32.mrf.mxu0 }
 0x1bd   : > { %v1778_v62 = vpop.f32.mrf.mxu3  ;;  %3132 = vmatmul.msk.bf16.gmra.mxu2 %vm979_vm4, %v4630_v45  ;;  %v1328_v43 = vpop.f32.mrf.mxu1 }
 0x1be   : > { %v1821_v7 = vadd.f32 %v1778_v62, %v1687_v24  ;;  %v1329_v17 = vadd.f32 %v1328_v43, %v4634_v37  ;;  %v4637_v24 = vld [vmem:[#allocation2_spill] sm:$0xff] }
 0x1c0   : > { %v1647_v57 = vpop.f32.mrf.mxu2  ;;  %v4315_v52 = vadd.f32 %v1934_v54, %v1821_v7  ;;  %v4638_v7 = vld [vmem:[#allocation28_spill] sm:$0xff] }
 0x1c1   : > { %v1688_v51 = vadd.f32 %v1647_v57, %v1327_v12 }
 0x1c2   : > { %3149 = vmatmul.msk.bf16.gmra.mxu3 %vm979_vm4, %v4632_v27 }
 0x1c4   : > { %v1937_v5 = vpop.f32.mrf.mxu0 }
 0x1c5   : > { %v1781_v60 = vpop.f32.mrf.mxu3  ;;  %v1331_v41 = vpop.f32.mrf.mxu1 }
 0x1c6   : > { %v1822_v2 = vadd.f32 %v1781_v60, %v1688_v51  ;;  %v1332_v18 = vadd.f32 %v1331_v41, %v4636_v48 }
 0x1c7   : > { %3167 = vmatmul.msk.bf16.gmra.mxu0 %vm979_vm4, %v4633_v30 }
 0x1c8   : > { %v1649_v63 = vpop.f32.mrf.mxu2  ;;  %3112 = vmatmul.msk.bf16.gmra.mxu1 %vm979_vm4, %v4633_v30  ;;  %v4324_v20 = vadd.f32 %v1937_v5, %v1822_v2  ;;  %v4640_v30 = vld [vmem:[#allocation27_spill] sm:$0xff] }
 0x1c9   : > { %v1689_v38 = vadd.f32 %v1649_v63, %v1329_v17 }
 0x1cc   : > { %v1939_v44 = vpop.f32.mrf.mxu0 }
 0x1cd   : > { %v1783_v55 = vpop.f32.mrf.mxu3  ;;  %3133 = vmatmul.msk.bf16.gmra.mxu2 %vm979_vm4, %v4635_v33  ;;  %v1333_v3 = vpop.f32.mrf.mxu1 }
 0x1ce   : > { %v1823_v40 = vadd.f32 %v1783_v55, %v1689_v38  ;;  %v1334_v12 = vadd.f32 %v1333_v3, %v4639_v1 }
 0x1d0   : > { %v1652_v6 = vpop.f32.mrf.mxu2  ;;  %v4329_v8 = vadd.f32 %v1939_v44, %v1823_v40  ;;  %v4641_v40 = vld [vmem:[#allocation29_spill] sm:$0xff] }
 0x1d1   : > { %v1690_v15 = vadd.f32 %v1652_v6, %v1332_v18 }
 0x1d2   : > { %3150 = vmatmul.msk.bf16.gmra.mxu3 %vm979_vm4, %v4637_v24 }
 0x1d4   : > { %v1942_v54 = vpop.f32.mrf.mxu0 }
 0x1d5   : > { %v1786_v62 = vpop.f32.mrf.mxu3  ;;  %v1336_v45 = vpop.f32.mrf.mxu1 }
 0x1d6   : > { %v1824_v43 = vadd.f32 %v1786_v62, %v1690_v15  ;;  %v1337_v37 = vadd.f32 %v1336_v45, %v4640_v30 }
 0x1d7   : > { %3168 = vmatmul.msk.bf16.gmra.mxu0 %vm979_vm4, %v4638_v7 }
 0x1d8   : > { %v1654_v57 = vpop.f32.mrf.mxu2  ;;  %3113 = vmatmul.msk.bf16.gmra.mxu1 %vm979_vm4, %v4638_v7  ;;  %v4338_v51 = vadd.f32 %v1942_v54, %v1824_v43 }
 0x1d9   : > { %v1691_v27 = vadd.f32 %v1654_v57, %v1334_v12 }
 0x1dc   : > { %v1944_v5 = vpop.f32.mrf.mxu0 }
 0x1dd   : > { %v1788_v60 = vpop.f32.mrf.mxu3  ;;  %3134 = vmatmul.msk.bf16.gmra.mxu2 %vm979_vm4, %v4025_v19  ;;  %v1338_v41 = vpop.f32.mrf.mxu1 }
 0x1de   : > { %v1825_v2 = vadd.f32 %v1788_v60, %v1691_v27  ;;  %v1339_v19 = vadd.f32 %v1338_v41, %v4641_v40 }
 0x1e0   : > { %v1657_v17 = vpop.f32.mrf.mxu2  ;;  %v4343_v63 = vadd.f32 %v1944_v5, %v1825_v2 }
 0x1e1   : > { %v1692_v38 = vadd.f32 %v1657_v17, %v1337_v37 }
 0x1e2   : > { %3151 = vmatmul.msk.bf16.gmra.mxu3 %vm979_vm4, %v3581_v4 }
 0x1e4   : > { %v1947_v44 = vpop.f32.mrf.mxu0 }
 0x1e5   : > { %v1791_v55 = vpop.f32.mrf.mxu3  ;;  %v2012_v33 = vpop.f32.mrf.mxu1 }
 0x1e6   : > { %v1826_v3 = vadd.f32 %v1791_v55, %v1692_v38  ;;  %v2092_v43 = vadd.f32 %v2012_v33, %v4040_v32  ;;  %v4642_v55 = vld [vmem:[#allocation15_spill] sm:$0xff] }
 0x1e7   : > { %3169 = vmatmul.msk.bf16.gmra.mxu0 %vm979_vm4, %v4042_v10 }
 0x1e8   : > { %v1659_v48 = vpop.f32.mrf.mxu2  ;;  %3114 = vmatmul.msk.bf16.gmra.mxu1 %vm979_vm4, %v4042_v10  ;;  %v4352_v18 = vadd.f32 %v1947_v44, %v1826_v3 }
 0x1e9   : > { %v1693_v6 = vadd.f32 %v1659_v48, %v1339_v19  ;;  %v4643_v48 = vld [vmem:[#allocation31_spill] sm:$0xff] }
 0x1ec   : > { %v1949_v15 = vpop.f32.mrf.mxu0 }
 0x1ed   : > { %v1793_v24 = vpop.f32.mrf.mxu3  ;;  %3135 = vmatmul.msk.bf16.gmra.mxu2 %vm979_vm4, %v4049_v42  ;;  %v2014_v4 = vpop.f32.mrf.mxu1 }
 0x1ee   : > { %v1827_v54 = vadd.f32 %v1793_v24, %v1693_v6  ;;  %v2093_v42 = vadd.f32 %v2014_v4, %v4053_v35 }
 0x1f0   : > { %v2146_v62 = vpop.f32.mrf.mxu2  ;;  %v4356_v45 = vadd.f32 %v1949_v15, %v1827_v54  ;;  %v4644_v15 = vld [vmem:[#allocation9_spill] sm:$0xff] }
 0x1f1   : > { %v2226_v7 = vadd.f32 %v2146_v62, %v2092_v43 }
 0x1f2   : > { %3152 = vmatmul.msk.bf16.gmra.mxu3 %vm979_vm4, %v3666_v25 }
 0x1f4   : > { %v2442_v10 = vpop.f32.mrf.mxu0 }
 0x1f5   : > { %v2302_v1 = vpop.f32.mrf.mxu3  ;;  %v2017_v12 = vpop.f32.mrf.mxu1 }
 0x1f6   : > { %v2382_v27 = vadd.f32 %v2302_v1, %v2226_v7  ;;  %v2094_v37 = vadd.f32 %v2017_v12, %v4066_v21  ;;  %v4645_v12 = vld [vmem:[#allocation32_spill] sm:$0xff] }
 0x1f7   : > { %3170 = vmatmul.msk.bf16.gmra.mxu0 %vm979_vm4, %v4068_v13 }
 0x1f8   : > { %v2148_v57 = vpop.f32.mrf.mxu2  ;;  %3115 = vmatmul.msk.bf16.gmra.mxu1 %vm979_vm4, %v4068_v13  ;;  %v2522_v25 = vadd.f32 %v2442_v10, %v2382_v27 }
 0x1f9   : > { %v2227_v5 = vadd.f32 %v2148_v57, %v2093_v42 }
 0x1fa   : > { %v2653_v35 = vmul.f32 %v2522_v25, %v2522_v25 }
 0x1fc   : > { %v2444_v60 = vpop.f32.mrf.mxu0 }
 0x1fd   : > { %v2304_v41 = vpop.f32.mrf.mxu3  ;;  %3136 = vmatmul.msk.bf16.gmra.mxu2 %vm979_vm4, %v4075_v50  ;;  %v2019_v32 = vpop.f32.mrf.mxu1 }
 0x1fe   : > { %v2383_v2 = vadd.f32 %v2304_v41, %v2227_v5  ;;  %v2095_v24 = vadd.f32 %v2019_v32, %v4644_v15  ;;  %v4646_v5 = vld [vmem:[#allocation30_spill] sm:$0xff] }
 0x200   : > { %v2523_v30 = vadd.f32 %v2444_v60, %v2383_v2  ;;  %v2151_v17 = vpop.f32.mrf.mxu2 }
 0x201   : > { %v2228_v50 = vadd.f32 %v2151_v17, %v2094_v37 }
 0x202   : > { %v3206_v13 = vpack.c.bf16 %v2523_v30, %v2522_v25  ;;  %v2619_v38 = vadd.f32 %v2523_v30, %v2522_v25  ;;  %v2654_v44 = vmul.f32 %v2523_v30, %v2523_v30  ;;  %3153 = vmatmul.msk.bf16.gmra.mxu3 %vm979_vm4, %v4642_v55  ;;  %v4647_v30 = vld [vmem:[#allocation3_spill] sm:$0xff] }
 0x203   : > { %v4648_v55 = vld [vmem:[#allocation35_spill] sm:$0xff] }
 0x204   : > { %3207 = vst [vmem:[%s4373_s10] sm:$0xff] %v3206_v13   ;;  %v2685_v33 = vadd.f32 %v2654_v44, %v2653_v35  ;;  %v2447_v3 = vpop.f32.mrf.mxu0 }
 0x205   : > { %v2307_v40 = vpop.f32.mrf.mxu3  ;;  %v2022_v21 = vpop.f32.mrf.mxu1 }
 0x206   : > { %v2384_v19 = vadd.f32 %v2307_v40, %v2228_v50  ;;  %v2096_v60 = vadd.f32 %v2022_v21, %v4646_v5 }
 0x207   : > { %3171 = vmatmul.msk.bf16.gmra.mxu0 %vm979_vm4, %v4643_v48 }
 0x208   : > { %v2524_v6 = vadd.f32 %v2447_v3, %v2384_v19  ;;  %v2153_v4 = vpop.f32.mrf.mxu2  ;;  %3116 = vmatmul.msk.bf16.gmra.mxu1 %vm979_vm4, %v4643_v48 }
 0x209   : > { %v2229_v43 = vadd.f32 %v2153_v4, %v2095_v24  ;;  %v4650_v4 = vld [vmem:[#allocation36_spill] sm:$0xff] }
 0x20a   : > { %v2620_v54 = vadd.f32 %v2619_v38, %v2524_v6  ;;  %v2655_v62 = vmul.f32 %v2524_v6, %v2524_v6 }
 0x20c   : > { %v2686_v10 = vadd.f32 %v2685_v33, %v2655_v62  ;;  %v2449_v7 = vpop.f32.mrf.mxu0  ;;  %v4649_v33 = vld [vmem:[#allocation33_spill] sm:$0xff] }
 0x20d   : > { %v2309_v1 = vpop.f32.mrf.mxu3  ;;  %3137 = vmatmul.msk.bf16.gmra.mxu2 %vm979_vm4, %v4645_v12  ;;  %v2024_v42 = vpop.f32.mrf.mxu1 }
 0x20e   : > { %v2385_v57 = vadd.f32 %v2309_v1, %v2229_v43  ;;  %v2097_v3 = vadd.f32 %v2024_v42, %v4649_v33 }
 0x210   : > { %v2525_v27 = vadd.f32 %v2449_v7, %v2385_v57  ;;  %v2156_v25 = vpop.f32.mrf.mxu2 }
 0x211   : > { %v2230_v37 = vadd.f32 %v2156_v25, %v2096_v60 }
 0x212   : > { %v3211_v41 = vpack.c.bf16 %v2525_v27, %v2524_v6  ;;  %v2621_v32 = vadd.f32 %v2620_v54, %v2525_v27  ;;  %v2656_v2 = vmul.f32 %v2525_v27, %v2525_v27  ;;  %3154 = vmatmul.msk.bf16.gmra.mxu3 %vm979_vm4, %v4647_v30  ;;  %v4652_v27 = vld [vmem:[#allocation4_spill] sm:$0xff]  ;;  %v4653_v30 = vld [vmem:[#allocation39_spill] sm:$0xff] }
 0x214   : > { %3283 = vst [vmem:[%s4373_s10 + $0x8] sm:$0xff] %v3211_v41   ;;  %v2687_v17 = vadd.f32 %v2686_v10, %v2656_v2  ;;  %v2452_v35 = vpop.f32.mrf.mxu0  ;;  %v4651_v10 = vld [vmem:[#allocation34_spill] sm:$0xff] }
 0x215   : > { %v2312_v13 = vpop.f32.mrf.mxu3  ;;  %v2027_v38 = vpop.f32.mrf.mxu1 }
 0x216   : > { %v2386_v44 = vadd.f32 %v2312_v13, %v2230_v37  ;;  %v2098_v7 = vadd.f32 %v2027_v38, %v4651_v10 }
 0x217   : > { %3172 = vmatmul.msk.bf16.gmra.mxu0 %vm979_vm4, %v4648_v55 }
 0x218   : > { %v2526_v50 = vadd.f32 %v2452_v35, %v2386_v44  ;;  %v2158_v40 = vpop.f32.mrf.mxu2  ;;  %3117 = vmatmul.msk.bf16.gmra.mxu1 %vm979_vm4, %v4648_v55 }
 0x219   : > { %v2231_v48 = vadd.f32 %v2158_v40, %v2097_v3  ;;  %v4655_v40 = vld [vmem:[#allocation6_spill] sm:$0xff] }
 0x21a   : > { %v2622_v21 = vadd.f32 %v2621_v32, %v2526_v50  ;;  %v2657_v19 = vmul.f32 %v2526_v50, %v2526_v50 }
 0x21c   : > { %v2688_v6 = vadd.f32 %v2687_v17, %v2657_v19  ;;  %v2454_v15 = vpop.f32.mrf.mxu0  ;;  %v4654_v17 = vld [vmem:[#allocation37_spill] sm:$0xff] }
 0x21d   : > { %v2314_v24 = vpop.f32.mrf.mxu3  ;;  %3138 = vmatmul.msk.bf16.gmra.mxu2 %vm979_vm4, %v4650_v4  ;;  %v2029_v54 = vpop.f32.mrf.mxu1 }
 0x21e   : > { %v2387_v62 = vadd.f32 %v2314_v24, %v2231_v48  ;;  %v2099_v35 = vadd.f32 %v2029_v54, %v4654_v17 }
 0x220   : > { %v2527_v43 = vadd.f32 %v2454_v15, %v2387_v62  ;;  %v2161_v1 = vpop.f32.mrf.mxu2 }
 0x221   : > { %v2232_v5 = vadd.f32 %v2161_v1, %v2098_v7 }
 0x222   : > { %v3216_v12 = vpack.c.bf16 %v2527_v43, %v2526_v50  ;;  %v2623_v42 = vadd.f32 %v2622_v21, %v2527_v43  ;;  %v2658_v57 = vmul.f32 %v2527_v43, %v2527_v43  ;;  %3155 = vmatmul.msk.bf16.gmra.mxu3 %vm979_vm4, %v4652_v27  ;;  %v4657_v43 = vld [vmem:[#allocation10_spill] sm:$0xff]  ;;  %v4658_v27 = vld [vmem:[#allocation41_spill] sm:$0xff] }
 0x224   : > { %3284 = vst [vmem:[%s4373_s10 + $0x10] sm:$0xff] %v3216_v12   ;;  %v2689_v60 = vadd.f32 %v2688_v6, %v2658_v57  ;;  %v2457_v25 = vpop.f32.mrf.mxu0  ;;  %v4656_v6 = vld [vmem:[#allocation38_spill] sm:$0xff] }
 0x225   : > { %v2317_v41 = vpop.f32.mrf.mxu3  ;;  %v2032_v32 = vpop.f32.mrf.mxu1 }
 0x226   : > { %v2388_v2 = vadd.f32 %v2317_v41, %v2232_v5  ;;  %v2100_v15 = vadd.f32 %v2032_v32, %v4656_v6 }
 0x227   : > { %3173 = vmatmul.msk.bf16.gmra.mxu0 %vm979_vm4, %v4653_v30 }
 0x228   : > { %v2528_v37 = vadd.f32 %v2457_v25, %v2388_v2  ;;  %v2163_v13 = vpop.f32.mrf.mxu2  ;;  %3118 = vmatmul.msk.bf16.gmra.mxu1 %vm979_vm4, %v4653_v30 }
 0x229   : > { %v2233_v55 = vadd.f32 %v2163_v13, %v2099_v35 }
 0x22a   : > { %v2624_v38 = vadd.f32 %v2623_v42, %v2528_v37  ;;  %v2659_v44 = vmul.f32 %v2528_v37, %v2528_v37 }
 0x22c   : > { %v2690_v50 = vadd.f32 %v2689_v60, %v2659_v44  ;;  %v2459_v33 = vpop.f32.mrf.mxu0  ;;  %v4659_v60 = vld [vmem:[#allocation7_spill] sm:$0xff] }
 0x22d   : > { %v2319_v3 = vpop.f32.mrf.mxu3  ;;  %3139 = vmatmul.msk.bf16.gmra.mxu2 %vm979_vm4, %v4655_v40  ;;  %v2034_v21 = vpop.f32.mrf.mxu1 }
 0x22e   : > { %v2389_v19 = vadd.f32 %v2319_v3, %v2233_v55  ;;  %v2101_v25 = vadd.f32 %v2034_v21, %v4659_v60  ;;  %v4660_v55 = vld [vmem:[#allocation40_spill] sm:$0xff] }
 0x230   : > { %v2529_v48 = vadd.f32 %v2459_v33, %v2389_v19  ;;  %v2166_v24 = vpop.f32.mrf.mxu2  ;;  %v4428_v19 = vld [vmem:[%s4422_s15] sm:$0xf] }
 0x231   : > { %v2234_v10 = vadd.f32 %v2166_v24, %v2100_v15  ;;  %v4661_v15 = vld [vmem:[#allocation42_spill] sm:$0xff] }
 0x232   : > { %v3221_v4 = vpack.c.bf16 %v2529_v48, %v2528_v37  ;;  %v2625_v54 = vadd.f32 %v2624_v38, %v2529_v48  ;;  %v2660_v62 = vmul.f32 %v2529_v48, %v2529_v48  ;;  %3156 = vmatmul.msk.bf16.gmra.mxu3 %vm979_vm4, %v4657_v43  ;;  %v1987_v24 = vrot.slane %v4661_v15, 5 }
 0x233   : > { %v2259_v43 = vshrl.u32 %v4428_v19, 16 }
 0x234   : > { %3285 = vst [vmem:[%s4373_s10 + $0x18] sm:$0xff] %v3221_v4   ;;  %v2691_v7 = vadd.f32 %v2690_v50, %v2660_v62  ;;  %v2462_v1 = vpop.f32.mrf.mxu0  ;;  %v4433_v4 = vld [vmem:[%s4422_s15 + $0x4] sm:$0xf]  ;;  %v1989_v60 = vrot.slane %v1987_v24, 4 }
 0x235   : > { %v2322_v12 = vpop.f32.mrf.mxu3  ;;  %v2037_v42 = vpop.f32.mrf.mxu1 }
 0x236   : > { %v2390_v57 = vadd.f32 %v2322_v12, %v2234_v10  ;;  %v2102_v50 = vadd.f32 %v2037_v42, %v4660_v55  ;;  %v2262_v10 = vshll.u32 %v4428_v19, 16  ;;  %v2268_v12 = vshll.u32 %v4433_v4, 16  ;;  %v540_v55 = vld [vmem:[%s4422_s15 + $0x8] sm:$0x1] }
 0x237   : > { %3174 = vmatmul.msk.bf16.gmra.mxu0 %vm979_vm4, %v4658_v27  ;;  %v2272_v42 = vshrl.u32 %v4433_v4, 16 }
 0x238   : > { %v2530_v5 = vadd.f32 %v2462_v1, %v2390_v57  ;;  %v2168_v41 = vpop.f32.mrf.mxu2  ;;  %3119 = vmatmul.msk.bf16.gmra.mxu1 %vm979_vm4, %v4658_v27 }
 0x239   : > { %v2235_v30 = vadd.f32 %v2168_v41, %v2101_v25  ;;  %v1990_v25 = vrot.slane %v4201_v22, 5  ;;  %v2261_v41 = vrot.slane %v2259_v43, 4 }
 0x23a   : > { %v2626_v32 = vadd.f32 %v2625_v54, %v2530_v5  ;;  %v2661_v2 = vmul.f32 %v2530_v5, %v2530_v5 }
 0x23c   : > { %v2692_v37 = vadd.f32 %v2691_v7, %v2661_v2  ;;  %v2464_v17 = vpop.f32.mrf.mxu0 }
 0x23d   : > { %v2324_v35 = vpop.f32.mrf.mxu3  ;;  %3140 = vmatmul.msk.bf16.gmra.mxu2 %vm979_vm4, %v4194_v58  ;;  %v2039_v13 = vpop.f32.mrf.mxu1 }
 0x23e   : > { %v2391_v38 = vadd.f32 %v2324_v35, %v2235_v30  ;;  %v2103_v27 = vadd.f32 %v2039_v13, %v4198_v49  ;;  %v2274_v35 = vrot.slane %v2272_v42, 4  ;;  %v1991_v13 = vsel %vm3773_vm7, %v1989_v60, %v1990_v25 }
 0x23f   : > { %v3160_v60 = vrot.slane %v4428_v19, 9 }
 0x240   : > { %v2531_v44 = vadd.f32 %v2464_v17, %v2391_v38  ;;  %v2171_v33 = vpop.f32.mrf.mxu2  ;;  %v2270_v17 = vrot.slane %v2268_v12, 5 }
 0x241   : > { %v2236_v58 = vadd.f32 %v2171_v33, %v2102_v50 }
 0x242   : > { %v3226_v3 = vpack.c.bf16 %v2531_v44, %v2530_v5  ;;  %v2627_v40 = vadd.f32 %v2626_v32, %v2531_v44  ;;  %v2662_v21 = vmul.f32 %v2531_v44, %v2531_v44  ;;  %3157 = vmatmul.msk.bf16.gmra.mxu3 %vm979_vm4, %v3782_v53  ;;  %v4662_v53 = vld [vmem:[#allocation5_spill] sm:$0xff]  ;;  %v2264_v32 = vrot.slane %v2262_v10, 5 }
 0x243   : > { %v3104_v1 = vrot.slane %v4662_v53, 9 }
 0x244   : > { %3286 = vst [vmem:[%s4373_s10 + $0x20] sm:$0xff] %v3226_v3   ;;  %v2693_v48 = vadd.f32 %v2692_v37, %v2662_v21  ;;  %v2467_v6 = vpop.f32.mrf.mxu0  ;;  %v2265_v50 = vor.u32 %v2264_v32, %v2261_v41  ;;  %v2275_v21 = vor.u32 %v2274_v35, %v2270_v17 }
 0x245   : > { %v2327_v54 = vpop.f32.mrf.mxu3  ;;  %v2042_v62 = vpop.f32.mrf.mxu1  ;;  %v1988_v49 = vsel %vm3773_vm7, %v3104_v1, %v1987_v24 }
 0x246   : > { %v2392_v7 = vadd.f32 %v2327_v54, %v2236_v58  ;;  %v1994_v3 = vunpack.c.l.b16 %v1988_v49  ;;  %v2278_v58 = vshll.u32 %v540_v55, 16  ;;  %v2266_v24 = vrot.slane %v2265_v50, 4 }
 0x247   : > { %3175 = vmatmul.msk.bf16.gmra.mxu0 %vm979_vm4, %v4217_v9  ;;  %v2276_v53 = vrot.slane %v2275_v21, 4 }
 0x248   : > { %v2532_v57 = vadd.f32 %v2467_v6, %v2392_v7  ;;  %v2173_v5 = vpop.f32.mrf.mxu2  ;;  %3120 = vmatmul.msk.bf16.gmra.mxu1 %vm979_vm4, %v4217_v9  ;;  %v2104_v6 = vadd.f32 %v2042_v62, %v4215_v46  ;;  %v2280_v1 = vrot.slane %v2278_v58, 5 }
 0x249   : > { %v2237_v37 = vadd.f32 %v2173_v5, %v2103_v27  ;;  %v2417_v27 = vrot.slane %v4433_v4, 5 }
 0x24a   : > { %v2628_v2 = vadd.f32 %v2627_v40, %v2532_v57  ;;  %v2663_v30 = vmul.f32 %v2532_v57, %v2532_v57  ;;  %v1995_v40 = vunpack.c.l.b16 %v1991_v13 }
 0x24b   : > { %v2419_v4 = vrot.slane %v2417_v27, 4  ;;  %v2418_v36 = vsel %vm3773_vm7, %v3160_v60, %v2417_v27 }
 0x24c   : > { %v2694_v38 = vadd.f32 %v2693_v48, %v2663_v30  ;;  %v2469_v44 = vpop.f32.mrf.mxu0  ;;  %v1996_v7 = vpack.c.b16 %v1995_v40, %v1994_v3  ;;  %v3202_v30 = vld [vmem:[%s4422_s15] sm:$0xff]  ;;  %v2424_v50 = vunpack.c.l.b16 %v2418_v36 }
 0x24d   : > { %v2329_v9 = vpop.f32.mrf.mxu3  ;;  %3141 = vmatmul.msk.bf16.gmra.mxu2 %vm979_vm4, %v4226_v11  ;;  %v2044_v22 = vpop.f32.mrf.mxu1 }
 0x24e   : > { %v2393_v33 = vadd.f32 %v2329_v9, %v2237_v37  ;;  %v2105_v41 = vadd.f32 %v2044_v22, %v4229_v28 }
 0x250   : > { %v2533_v48 = vadd.f32 %v2469_v44, %v2393_v33  ;;  %v2176_v15 = vpop.f32.mrf.mxu2 }
 0x251   : > { %v2238_v11 = vadd.f32 %v2176_v15, %v2104_v6 }
 0x252   : > { %v3231_v54 = vpack.c.bf16 %v2533_v48, %v2532_v57  ;;  %v2629_v43 = vadd.f32 %v2628_v2, %v2533_v48  ;;  %v2664_v10 = vmul.f32 %v2533_v48, %v2533_v48  ;;  %3158 = vmatmul.msk.bf16.gmra.mxu3 %vm979_vm4, %v4233_v47  ;;  %v2271_v57 = vsel %vm3470_vm3, %v2266_v24, %v2270_v17 }
 0x253   : > { %v2281_v47 = vsel %vm3470_vm3, %v2276_v53, %v2280_v1  ;;  %v2420_v2 = vrot.slane %v540_v55, 5  ;;  %v2284_v37 = vunpack.c.l.b16 %v2271_v57 }
 0x254   : > { %3287 = vst [vmem:[%s4373_s10 + $0x28] sm:$0xff] %v3231_v54   ;;  %v2695_v12 = vadd.f32 %v2694_v38, %v2664_v10  ;;  %v2472_v42 = vpop.f32.mrf.mxu0  ;;  %v2285_v44 = vunpack.c.l.b16 %v2281_v47 }
 0x255   : > { %v2332_v5 = vpop.f32.mrf.mxu3  ;;  %v2047_v46 = vpop.f32.mrf.mxu1  ;;  %v2421_v19 = vsel %vm3773_vm7, %v2419_v4, %v2420_v2 }
 0x256   : > { %v2394_v62 = vadd.f32 %v2332_v5, %v2238_v11  ;;  %v2286_v22 = vpack.c.b16 %v2285_v44, %v2284_v37  ;;  %v2425_v33 = vunpack.c.l.b16 %v2421_v19  ;;  %v2106_v40 = vadd.f32 %v2047_v46, %v4240_v34 }
 0x257   : > { %3176 = vmatmul.msk.bf16.gmra.mxu0 %vm979_vm4, %v1996_v7 }
 0x258   : > { %v2534_v25 = vadd.f32 %v2472_v42, %v2394_v62  ;;  %v2178_v32 = vpop.f32.mrf.mxu2  ;;  %3121 = vmatmul.msk.bf16.gmra.mxu1 %vm979_vm4, %v1996_v7  ;;  %v2426_v15 = vpack.c.b16 %v2425_v33, %v2424_v50 }
 0x259   : > { %v2239_v17 = vadd.f32 %v2178_v32, %v2105_v41 }
 0x25a   : > { %v2630_v35 = vadd.f32 %v2629_v43, %v2534_v25  ;;  %v2665_v38 = vmul.f32 %v2534_v25, %v2534_v25 }
 0x25c   : > { %v2696_v49 = vadd.f32 %v2695_v12, %v2665_v38  ;;  %v2474_v13 = vpop.f32.mrf.mxu0 }
 0x25d   : > { %v2334_v28 = vpop.f32.mrf.mxu3  ;;  %3142 = vmatmul.msk.bf16.gmra.mxu2 %vm979_vm4, %v3202_v30  ;;  %v2049_v9 = vpop.f32.mrf.mxu1 }
 0x25e   : > { %v2395_v55 = vadd.f32 %v2334_v28, %v2239_v17  ;;  %v2107_v53 = vadd.f32 %v2049_v9, %v4245_v61 }
 0x260   : > { %v2535_v3 = vadd.f32 %v2474_v13, %v2395_v55  ;;  %v2181_v21 = vpop.f32.mrf.mxu2 }
 0x261   : > { %v2240_v14 = vadd.f32 %v2181_v21, %v2106_v40 }
 0x262   : > { %v3236_v58 = vpack.c.bf16 %v2535_v3, %v2534_v25  ;;  %v2631_v48 = vadd.f32 %v2630_v35, %v2535_v3  ;;  %v2666_v6 = vmul.f32 %v2535_v3, %v2535_v3  ;;  %3159 = vmatmul.msk.bf16.gmra.mxu3 %vm979_vm4, %v2286_v22 }
 0x264   : > { %3288 = vst [vmem:[%s4373_s10 + $0x30] sm:$0xff] %v3236_v58   ;;  %v2697_v24 = vadd.f32 %v2696_v49, %v2666_v6  ;;  %v2477_v54 = vpop.f32.mrf.mxu0 }
 0x265   : > { %v2337_v43 = vpop.f32.mrf.mxu3  ;;  %v2052_v10 = vpop.f32.mrf.mxu1 }
 0x266   : > { %v2396_v11 = vadd.f32 %v2337_v43, %v2240_v14  ;;  %v2108_v60 = vadd.f32 %v2052_v10, %v4254_v16 }
 0x267   : > { %3177 = vmatmul.msk.bf16.gmra.mxu0 %vm979_vm4, %v2426_v15 }
 0x268   : > { %v2536_v7 = vadd.f32 %v2477_v54, %v2396_v11  ;;  %v2183_v34 = vpop.f32.mrf.mxu2 }
 0x269   : > { %v2241_v42 = vadd.f32 %v2183_v34, %v2107_v53 }
 0x26a   : > { %v2632_v1 = vadd.f32 %v2631_v48, %v2536_v7  ;;  %v2667_v12 = vmul.f32 %v2536_v7, %v2536_v7 }
 0x26c   : > { %v2698_v27 = vadd.f32 %v2697_v24, %v2667_v12  ;;  %v2479_v5 = vpop.f32.mrf.mxu0 }
 0x26d   : > { %v2339_v46 = vpop.f32.mrf.mxu3  ;;  %v2054_v62 = vpop.f32.mrf.mxu1 }
 0x26e   : > { %v2397_v57 = vadd.f32 %v2339_v46, %v2241_v42  ;;  %v2109_v44 = vadd.f32 %v2054_v62, %v4259_v26 }
 0x270   : > { %v2537_v47 = vadd.f32 %v2479_v5, %v2397_v57  ;;  %v2186_v25 = vpop.f32.mrf.mxu2 }
 0x271   : > { %v2242_v2 = vadd.f32 %v2186_v25, %v2108_v60 }
 0x272   : > { %v3241_v41 = vpack.c.bf16 %v2537_v47, %v2536_v7  ;;  %v2633_v32 = vadd.f32 %v2632_v1, %v2537_v47  ;;  %v2668_v4 = vmul.f32 %v2537_v47, %v2537_v47 }
 0x274   : > { %3289 = vst [vmem:[%s4373_s10 + $0x38] sm:$0xff] %v3241_v41   ;;  %v2699_v61 = vadd.f32 %v2698_v27, %v2668_v4  ;;  %v2482_v30 = vpop.f32.mrf.mxu0 }
 0x275   : > { %v2342_v37 = vpop.f32.mrf.mxu3  ;;  %v2057_v35 = vpop.f32.mrf.mxu1 }
 0x276   : > { %v2398_v38 = vadd.f32 %v2342_v37, %v2242_v2  ;;  %v2110_v33 = vadd.f32 %v2057_v35, %v4268_v59 }
 0x278   : > { %v2538_v17 = vadd.f32 %v2482_v30, %v2398_v38  ;;  %v2188_v49 = vpop.f32.mrf.mxu2 }
 0x279   : > { %v2243_v19 = vadd.f32 %v2188_v49, %v2109_v44 }
 0x27a   : > { %v2634_v13 = vadd.f32 %v2633_v32, %v2538_v17  ;;  %v2669_v36 = vmul.f32 %v2538_v17, %v2538_v17 }
 0x27c   : > { %v2700_v16 = vadd.f32 %v2699_v61, %v2669_v36  ;;  %v2484_v28 = vpop.f32.mrf.mxu0 }
 0x27d   : > { %v2344_v9 = vpop.f32.mrf.mxu3  ;;  %v2059_v55 = vpop.f32.mrf.mxu1 }
 0x27e   : > { %v2399_v22 = vadd.f32 %v2344_v9, %v2243_v19  ;;  %v2111_v43 = vadd.f32 %v2059_v55, %v4273_v31 }
 0x280   : > { %v2539_v50 = vadd.f32 %v2484_v28, %v2399_v22  ;;  %v2191_v3 = vpop.f32.mrf.mxu2 }
 0x281   : > { %v2244_v48 = vadd.f32 %v2191_v3, %v2110_v33 }
 0x282   : > { %v3246_v40 = vpack.c.bf16 %v2539_v50, %v2538_v17  ;;  %v2635_v21 = vadd.f32 %v2634_v13, %v2539_v50  ;;  %v2670_v58 = vmul.f32 %v2539_v50, %v2539_v50 }
 0x284   : > { %3290 = vst [vmem:[%s4373_s10 + $0x40] sm:$0xff] %v3246_v40   ;;  %v2701_v26 = vadd.f32 %v2700_v16, %v2670_v58  ;;  %v2487_v6 = vpop.f32.mrf.mxu0 }
 0x285   : > { %v2347_v14 = vpop.f32.mrf.mxu3  ;;  %v2062_v15 = vpop.f32.mrf.mxu1 }
 0x286   : > { %v2400_v24 = vadd.f32 %v2347_v14, %v2244_v48  ;;  %v2112_v5 = vadd.f32 %v2062_v15, %v4282_v23 }
 0x288   : > { %v2540_v54 = vadd.f32 %v2487_v6, %v2400_v24  ;;  %v2193_v10 = vpop.f32.mrf.mxu2 }
 0x289   : > { %v2245_v53 = vadd.f32 %v2193_v10, %v2111_v43 }
 0x28a   : > { %v2636_v11 = vadd.f32 %v2635_v21, %v2540_v54  ;;  %v2671_v7 = vmul.f32 %v2540_v54, %v2540_v54 }
 0x28c   : > { %v2702_v59 = vadd.f32 %v2701_v26, %v2671_v7  ;;  %v2489_v34 = vpop.f32.mrf.mxu0 }
 0x28d   : > { %v2349_v1 = vpop.f32.mrf.mxu3  ;;  %v2064_v12 = vpop.f32.mrf.mxu1 }
 0x28e   : > { %v2401_v42 = vadd.f32 %v2349_v1, %v2245_v53  ;;  %v2113_v61 = vadd.f32 %v2064_v12, %v4287_v39 }
 0x290   : > { %v2541_v27 = vadd.f32 %v2489_v34, %v2401_v42  ;;  %v2196_v46 = vpop.f32.mrf.mxu2 }
 0x291   : > { %v2246_v60 = vadd.f32 %v2196_v46, %v2112_v5 }
 0x292   : > { %v3251_v62 = vpack.c.bf16 %v2541_v27, %v2540_v54  ;;  %v2637_v57 = vadd.f32 %v2636_v11, %v2541_v27  ;;  %v2672_v47 = vmul.f32 %v2541_v27, %v2541_v27 }
 0x294   : > { %3291 = vst [vmem:[%s4373_s10 + $0x48] sm:$0xff] %v3251_v62   ;;  %v2703_v31 = vadd.f32 %v2702_v59, %v2672_v47  ;;  %v2492_v25 = vpop.f32.mrf.mxu0 }
 0x295   : > { %v2352_v41 = vpop.f32.mrf.mxu3  ;;  %v2067_v32 = vpop.f32.mrf.mxu1 }
 0x296   : > { %v2402_v4 = vadd.f32 %v2352_v41, %v2246_v60  ;;  %v2114_v19 = vadd.f32 %v2067_v32, %v4296_v56 }
 0x298   : > { %v2542_v2 = vadd.f32 %v2492_v25, %v2402_v4  ;;  %v2198_v30 = vpop.f32.mrf.mxu2 }
 0x299   : > { %v2247_v38 = vadd.f32 %v2198_v30, %v2113_v61 }
 0x29a   : > { %v2638_v37 = vadd.f32 %v2637_v57, %v2542_v2  ;;  %v2673_v35 = vmul.f32 %v2542_v2, %v2542_v2 }
 0x29c   : > { %v2704_v23 = vadd.f32 %v2703_v31, %v2673_v35  ;;  %v2494_v17 = vpop.f32.mrf.mxu0 }
 0x29d   : > { %v2354_v44 = vpop.f32.mrf.mxu3  ;;  %v2069_v49 = vpop.f32.mrf.mxu1 }
 0x29e   : > { %v2403_v13 = vadd.f32 %v2354_v44, %v2247_v38  ;;  %v2115_v58 = vadd.f32 %v2069_v49, %v4301_v0 }
 0x2a0   : > { %v2543_v36 = vadd.f32 %v2494_v17, %v2403_v13  ;;  %v2201_v16 = vpop.f32.mrf.mxu2 }
 0x2a1   : > { %v2248_v22 = vadd.f32 %v2201_v16, %v2114_v19 }
 0x2a2   : > { %v3256_v28 = vpack.c.bf16 %v2543_v36, %v2542_v2  ;;  %v2639_v9 = vadd.f32 %v2638_v37, %v2543_v36  ;;  %v2674_v55 = vmul.f32 %v2543_v36, %v2543_v36 }
 0x2a4   : > { %3292 = vst [vmem:[%s4373_s10 + $0x50] sm:$0xff] %v3256_v28   ;;  %v2705_v39 = vadd.f32 %v2704_v23, %v2674_v55  ;;  %v2497_v50 = vpop.f32.mrf.mxu0 }
 0x2a5   : > { %v2357_v33 = vpop.f32.mrf.mxu3  ;;  %v2072_v3 = vpop.f32.mrf.mxu1 }
 0x2a6   : > { %v2404_v40 = vadd.f32 %v2357_v33, %v2248_v22  ;;  %v2116_v11 = vadd.f32 %v2072_v3, %v4310_v29 }
 0x2a8   : > { %v2544_v21 = vadd.f32 %v2497_v50, %v2404_v40  ;;  %v2203_v48 = vpop.f32.mrf.mxu2 }
 0x2a9   : > { %v2249_v14 = vadd.f32 %v2203_v48, %v2115_v58 }
 0x2aa   : > { %v2640_v26 = vadd.f32 %v2639_v9, %v2544_v21  ;;  %v2675_v6 = vmul.f32 %v2544_v21, %v2544_v21 }
 0x2ac   : > { %v2706_v56 = vadd.f32 %v2705_v39, %v2675_v6  ;;  %v2499_v15 = vpop.f32.mrf.mxu0 }
 0x2ad   : > { %v2359_v24 = vpop.f32.mrf.mxu3  ;;  %v2074_v54 = vpop.f32.mrf.mxu1 }
 0x2ae   : > { %v2405_v43 = vadd.f32 %v2359_v24, %v2249_v14  ;;  %v2117_v62 = vadd.f32 %v2074_v54, %v4315_v52 }
 0x2b0   : > { %v2545_v10 = vadd.f32 %v2499_v15, %v2405_v43  ;;  %v2206_v7 = vpop.f32.mrf.mxu2 }
 0x2b1   : > { %v2250_v1 = vadd.f32 %v2206_v7, %v2116_v11 }
 0x2b2   : > { %v3261_v53 = vpack.c.bf16 %v2545_v10, %v2544_v21  ;;  %v2641_v59 = vadd.f32 %v2640_v26, %v2545_v10  ;;  %v2676_v34 = vmul.f32 %v2545_v10, %v2545_v10 }
 0x2b4   : > { %3293 = vst [vmem:[%s4373_s10 + $0x58] sm:$0xff] %v3261_v53   ;;  %v2707_v0 = vadd.f32 %v2706_v56, %v2676_v34  ;;  %v2502_v12 = vpop.f32.mrf.mxu0 }
 0x2b5   : > { %v2362_v42 = vpop.f32.mrf.mxu3  ;;  %v2077_v27 = vpop.f32.mrf.mxu1 }
 0x2b6   : > { %v2406_v5 = vadd.f32 %v2362_v42, %v2250_v1  ;;  %v2118_v61 = vadd.f32 %v2077_v27, %v4324_v20 }
 0x2b8   : > { %v2546_v46 = vadd.f32 %v2502_v12, %v2406_v5  ;;  %v2208_v57 = vpop.f32.mrf.mxu2 }
 0x2b9   : > { %v2251_v31 = vadd.f32 %v2208_v57, %v2117_v62 }
 0x2ba   : > { %v2642_v47 = vadd.f32 %v2641_v59, %v2546_v46  ;;  %v2677_v60 = vmul.f32 %v2546_v46, %v2546_v46 }
 0x2bc   : > { %v2708_v29 = vadd.f32 %v2707_v0, %v2677_v60  ;;  %v2504_v25 = vpop.f32.mrf.mxu0 }
 0x2bd   : > { %v2364_v41 = vpop.f32.mrf.mxu3  ;;  %v2079_v32 = vpop.f32.mrf.mxu1 }
 0x2be   : > { %v2407_v4 = vadd.f32 %v2364_v41, %v2251_v31  ;;  %v2119_v19 = vadd.f32 %v2079_v32, %v4329_v8 }
 0x2c0   : > { %v2547_v2 = vadd.f32 %v2504_v25, %v2407_v4  ;;  %v2211_v30 = vpop.f32.mrf.mxu2 }
 0x2c1   : > { %v2252_v23 = vadd.f32 %v2211_v30, %v2118_v61 }
 0x2c2   : > { %v3266_v37 = vpack.c.bf16 %v2547_v2, %v2546_v46  ;;  %v2643_v35 = vadd.f32 %v2642_v47, %v2547_v2  ;;  %v2678_v38 = vmul.f32 %v2547_v2, %v2547_v2 }
 0x2c4   : > { %3294 = vst [vmem:[%s4373_s10 + $0x60] sm:$0xff] %v3266_v37   ;;  %v2709_v52 = vadd.f32 %v2708_v29, %v2678_v38  ;;  %v2507_v17 = vpop.f32.mrf.mxu0 }
 0x2c5   : > { %v2367_v44 = vpop.f32.mrf.mxu3  ;;  %v2082_v13 = vpop.f32.mrf.mxu1 }
 0x2c6   : > { %v2408_v49 = vadd.f32 %v2367_v44, %v2252_v23  ;;  %v2120_v3 = vadd.f32 %v2082_v13, %v4338_v51 }
 0x2c8   : > { %v2548_v36 = vadd.f32 %v2507_v17, %v2408_v49  ;;  %v2213_v16 = vpop.f32.mrf.mxu2 }
 0x2c9   : > { %v2253_v55 = vadd.f32 %v2213_v16, %v2119_v19 }
 0x2ca   : > { %v2644_v28 = vadd.f32 %v2643_v35, %v2548_v36  ;;  %v2679_v9 = vmul.f32 %v2548_v36, %v2548_v36 }
 0x2cc   : > { %v2710_v20 = vadd.f32 %v2709_v52, %v2679_v9  ;;  %v2509_v22 = vpop.f32.mrf.mxu0 }
 0x2cd   : > { %v2369_v39 = vpop.f32.mrf.mxu3  ;;  %v2084_v21 = vpop.f32.mrf.mxu1 }
 0x2ce   : > { %v2409_v50 = vadd.f32 %v2369_v39, %v2253_v55  ;;  %v2121_v54 = vadd.f32 %v2084_v21, %v4343_v63 }
 0x2d0   : > { %v2549_v33 = vadd.f32 %v2509_v22, %v2409_v50  ;;  %v2216_v40 = vpop.f32.mrf.mxu2 }
 0x2d1   : > { %v2254_v6 = vadd.f32 %v2216_v40, %v2120_v3 }
 0x2d2   : > { %v3271_v58 = vpack.c.bf16 %v2549_v33, %v2548_v36  ;;  %v2645_v48 = vadd.f32 %v2644_v28, %v2549_v33  ;;  %v2680_v26 = vmul.f32 %v2549_v33, %v2549_v33 }
 0x2d4   : > { %3295 = vst [vmem:[%s4373_s10 + $0x68] sm:$0xff] %v3271_v58   ;;  %v2711_v8 = vadd.f32 %v2710_v20, %v2680_v26  ;;  %v2512_v14 = vpop.f32.mrf.mxu0 }
 0x2d5   : > { %v2372_v56 = vpop.f32.mrf.mxu3  ;;  %v2087_v51 = vpop.f32.mrf.mxu1 }
 0x2d6   : > { %v2410_v15 = vadd.f32 %v2372_v56, %v2254_v6  ;;  %v2122_v12 = vadd.f32 %v2087_v51, %v4352_v18 }
 0x2d8   : > { %v2550_v24 = vadd.f32 %v2512_v14, %v2410_v15  ;;  %v2218_v43 = vpop.f32.mrf.mxu2 }
 0x2d9   : > { %v2255_v7 = vadd.f32 %v2218_v43, %v2121_v54 }
 0x2da   : > { %v2646_v10 = vadd.f32 %v2645_v48, %v2550_v24  ;;  %v2681_v11 = vmul.f32 %v2550_v24, %v2550_v24 }
 0x2dc   : > { %v2712_v53 = vadd.f32 %v2711_v8, %v2681_v11  ;;  %v2514_v59 = vpop.f32.mrf.mxu0 }
 0x2dd   : > { %v2374_v34 = vpop.f32.mrf.mxu3  ;;  %v2089_v57 = vpop.f32.mrf.mxu1 }
 0x2de   : > { %v2411_v1 = vadd.f32 %v2374_v34, %v2255_v7  ;;  %v2123_v25 = vadd.f32 %v2089_v57, %v4356_v45 }
 0x2e0   : > { %v2551_v0 = vadd.f32 %v2514_v59, %v2411_v1  ;;  %v2221_v42 = vpop.f32.mrf.mxu2 }
 0x2e1   : > { %v2256_v62 = vadd.f32 %v2221_v42, %v2122_v12 }
 0x2e2   : > { %v3276_v27 = vpack.c.bf16 %v2551_v0, %v2550_v24  ;;  %v2647_v5 = vadd.f32 %v2646_v10, %v2551_v0  ;;  %v2682_v46 = vmul.f32 %v2551_v0, %v2551_v0 }
 0x2e4   : > { %3296 = vst [vmem:[%s4373_s10 + $0x70] sm:$0xff] %v3276_v27   ;;  %v2713_v63 = vadd.f32 %v2712_v53, %v2682_v46  ;;  %v2517_v47 = vpop.f32.mrf.mxu0 }
 0x2e5   : > { %v2377_v60 = vpop.f32.mrf.mxu3 }
 0x2e6   : > { %v2412_v31 = vadd.f32 %v2377_v60, %v2256_v62 }
 0x2e8   : > { %v2552_v29 = vadd.f32 %v2517_v47, %v2412_v31  ;;  %v2223_v41 = vpop.f32.mrf.mxu2 }
 0x2e9   : > { %v2257_v18 = vadd.f32 %v2223_v41, %v2123_v25 }
 0x2ea   : > { %v2648_v32 = vadd.f32 %v2647_v5, %v2552_v29  ;;  %v2683_v4 = vmul.f32 %v2552_v29, %v2552_v29 }
 0x2ec   : > { %v2714_v2 = vadd.f32 %v2713_v63, %v2683_v4  ;;  %v2519_v37 = vpop.f32.mrf.mxu0 }
 0x2ed   : > { %v2379_v61 = vpop.f32.mrf.mxu3 }
 0x2ee   : > { %v2413_v30 = vadd.f32 %v2379_v61, %v2257_v18 }
 0x2f0   : > { %v2553_v35 = vadd.f32 %v2519_v37, %v2413_v30 }
 0x2f2   : > { %v3281_v38 = vpack.c.bf16 %v2553_v35, %v2552_v29  ;;  %v2649_v23 = vadd.f32 %v2648_v32, %v2553_v35  ;;  %v2684_v52 = vmul.f32 %v2553_v35, %v2553_v35 }
 0x2f4   : > { %3297 = vst [vmem:[%s4373_s10 + $0x78] sm:$0xff] %v3281_v38   ;;  %v2715_v17 = vadd.f32 %v2714_v2, %v2684_v52 }
 0x2f5   : > { %2651 = vst [vmem:[%s473_s18] sm:$0xff] %v2649_v23 }
 0x2f6   : > { %2717 = vst [vmem:[%s477_s25] sm:$0xff] %v2715_v17 }
 0x2f7 PF: > { %s17_s23 = sadd.s32 1, %s3359_s23   ;;  %s4663_s21 = smov %s3355_s22 }
 0x2f8   : > { %p14_p5 = scmp.ge.s32.totalorder %s17_s23, 4   ;;  %s4664_s22 = smov %s4666_s24 }
 0x2fa   :  { %16 = sbr.rel (!%p14_p5) target bundleno = 2 (0x2), region = 108 }

</bundles_post_ra>
